<compile_context>
chip_gen: v6e
topology: v6e:2x2x1
jax: 0.10.0
libtpu: 0.0.40
codegen_flags: <defaults>
</compile_context>

<pallas_src>
import jax
import jax.numpy as jnp
from jax import lax
from jax.experimental import pallas as pl
from jax.experimental.pallas import tpu as pltpu
from jax.scipy.special import erf as _erf_exact

# ---- model config (small stand-ins, consistent with the module) ----
C_FEAT = 128    # stands in for resnet50.fc.in_features (2048) at small scale
SEQ    = 8      # config.img_hidden_seq
HID    = 128    # config.middle_hidden_size (picked lane-dense: 128 lanes)
P      = 49     # 7 * 7 spatial positions after the backbone
P_PAD  = 64     # P zero-padded to a bf16 sublane-tile multiple
TB     = 8      # images per grid step (keeps grid even >= 2 on v7x)
BN_EPS = 1e-5
LN_EPS = 1e-5

_INV_SQRT2 = 0.7071067811865476
_HIGHEST = lax.Precision.HIGHEST


def _erf_kernel(x):
    # Abramowitz & Stegun 7.1.26 rational approximation (max abs err ~1.5e-7),
    # with the divide replaced by the EUP approximate reciprocal.
    a1, a2, a3, a4, a5 = (0.254829592, -0.284496736, 1.421413741,
                          -1.453152027, 1.061405429)
    p = 0.3275911
    s = jnp.where(x >= 0.0, 1.0, -1.0)
    ax = jnp.abs(x)
    t = pl.reciprocal(1.0 + p * ax, approx=True)
    poly = ((((a5 * t + a4) * t + a3) * t + a2) * t + a1) * t
    return s * (1.0 - poly * jnp.exp(-ax * ax))


def _gelu_kernel(x):
    # erf-based GELU, matching torch.nn.GELU() default
    return 0.5 * x * (1.0 + _erf_kernel(x * _INV_SQRT2))


def _gelu_ref(x):
    return 0.5 * x * (1.0 + _erf_exact(x * _INV_SQRT2))


# --------------------------------------------------------------------------
# Pallas kernel: one grid step handles TB images, fully batched.
#   x_ref      : (TB*P_PAD, C)     bf16  hidden_state, channels on lanes
#   convw_ref  : (SEQ, C)          bf16  BN-folded 1x1 conv weight
#   lin1_ref   : (P_PAD, HID)      bf16  Linear(49->HID) weight^T, zero-padded
#   bias1_ref  : (TB*SEQ, HID)     f32   conv-bias + lin1-bias, tiled over TB
#   pool_ref   : (TB, TB*P_PAD)    bf16  block-diag avg-pool matrix (1/49)
#   ln_ref     : (2, C)            f32   [gamma; beta] of LayerNorm(C)
#   lin2_ref   : (C, HID)          bf16  Linear(C->HID) weight^T
#   lin2b_ref  : (1, HID)          f32   Linear(C->HID) bias
#   out1_ref   : (TB*SEQ, HID)     f32   rows ordered (image, seq)
#   out2_ref   : (TB, HID)         f32
# --------------------------------------------------------------------------
def _image_model_kernel(x_ref, convw_ref, lin1_ref, bias1_ref, pool_ref,
                        ln_ref, lin2_ref, lin2b_ref, out1_ref, out2_ref):
    x2d = x_ref[...]                                   # (TB*P_PAD, C) bf16

    # ---- hidden_trans: BN(folded) -> 1x1 conv -> Linear(P->HID) -> GELU ----
    # y[s, b*P_PAD + p] = sum_c convw[s, c] * x[b, p, c]    (one MXU matmul)
    y = lax.dot_general(convw_ref[...], x2d,
                        dimension_numbers=(((1,), (1,)), ((), ())),
                        preferred_element_type=jnp.float32)   # (SEQ, TB*P_PAD)

    # Regroup to rows (b, s), cols p: static lane slices stacked on sublanes.
    yb = jnp.concatenate(
        [y[:, b * P_PAD:(b + 1) * P_PAD] for b in range(TB)],
        axis=0)                                               # (TB*SEQ, P_PAD)

    # Dropout is identity at inference; conv/lin1 biases folded into bias1.
    z = jnp.dot(yb.astype(jnp.bfloat16), lin1_ref[...],
                preferred_element_type=jnp.float32)           # (TB*SEQ, HID)
    out1_ref[...] = _gelu_kernel(z + bias1_ref[...])

    # ---- trans: AdaptiveAvgPool2d((1,1)) -> LayerNorm(C) -> Linear -> GELU --
    # Pooling as one MXU matmul with the block-diagonal 1/49 matrix.
    f = jnp.dot(pool_ref[...], x2d,
                preferred_element_type=jnp.float32)           # (TB, C)
    mu = jnp.mean(f, axis=1, keepdims=True)                   # (TB, 1)
    var = jnp.mean(jnp.square(f - mu), axis=1, keepdims=True) # (TB, 1)
    ln = ln_ref[...]
    fln = (f - mu) * lax.rsqrt(var + LN_EPS) * ln[0:1, :] + ln[1:2, :]
    o2 = jnp.dot(fln.astype(jnp.bfloat16), lin2_ref[...],
                 preferred_element_type=jnp.float32) + lin2b_ref[...]
    out2_ref[...] = _gelu_kernel(o2)                          # (TB, HID)


def image_model_forward(hidden_state, kp):
    """hidden_state: (B, C_FEAT, 7, 7) f32 -> ((B, SEQ, HID), (B, HID))."""
    B = hidden_state.shape[0]
    assert B % TB == 0, "batch must be a multiple of TB"
    # (B, C, 7, 7) -> (B, P, C) -> zero-pad P to P_PAD -> bf16 -> (B*P_PAD, C).
    x = hidden_state.reshape(B, C_FEAT, P).transpose(0, 2, 1)      # (B, P, C)
    x = jnp.pad(x, ((0, 0), (0, P_PAD - P), (0, 0)))               # (B, P_PAD, C)
    x = x.astype(jnp.bfloat16).reshape(B * P_PAD, C_FEAT)

    out1_flat, out2 = pl.pallas_call(
        _image_model_kernel,
        out_shape=(jax.ShapeDtypeStruct((B * SEQ, HID), jnp.float32),
                   jax.ShapeDtypeStruct((B, HID), jnp.float32)),
        grid_spec=pltpu.PrefetchScalarGridSpec(
            num_scalar_prefetch=0,
            grid=(B // TB,),
            in_specs=[
                pl.BlockSpec((TB * P_PAD, C_FEAT), lambda i: (i, 0)),  # x
                pl.BlockSpec((SEQ, C_FEAT), lambda i: (0, 0)),         # conv w
                pl.BlockSpec((P_PAD, HID), lambda i: (0, 0)),          # lin1 w^T
                pl.BlockSpec((TB * SEQ, HID), lambda i: (0, 0)),       # fused bias
                pl.BlockSpec((TB, TB * P_PAD), lambda i: (0, 0)),      # pool mat
                pl.BlockSpec((2, C_FEAT), lambda i: (0, 0)),           # ln g/b
                pl.BlockSpec((C_FEAT, HID), lambda i: (0, 0)),         # lin2 w^T
                pl.BlockSpec((1, HID), lambda i: (0, 0)),              # lin2 b
            ],
            out_specs=[
                pl.BlockSpec((TB * SEQ, HID), lambda i: (i, 0)),
                pl.BlockSpec((TB, HID), lambda i: (i, 0)),
            ],
        ),
        compiler_params=pltpu.CompilerParams(
            dimension_semantics=("parallel",)),
    )(x, kp["conv_w"], kp["lin1_wT"], kp["bias1_t"], kp["pool"],
      kp["ln"], kp["lin2_wT"], kp["lin2_b"])
    return out1_flat.reshape(B, SEQ, HID), out2


# --------------------------------------------------------------------------
# Host-side parameter preparation (inference BN fold, bias fusion, padding,
# bf16 casts for all MXU weight operands).
# --------------------------------------------------------------------------
def fold_params(p):
    scale = p["bn_g"] * lax.rsqrt(p["bn_v"] + BN_EPS)          # (C,)
    shift = p["bn_b"] - p["bn_m"] * scale                      # (C,)
    conv_w = p["conv_w"] * scale[None, :]                      # (SEQ, C)
    conv_b = p["conv_w"] @ shift + p["conv_b"]                 # (SEQ,)
    lin1_wT = p["lin1_w"].T                                    # (P, HID)
    lin1_pad = jnp.pad(lin1_wT, ((0, P_PAD - P), (0, 0)))      # (P_PAD, HID)
    # z = (y + conv_b) @ lin1_wT + lin1_b  ==  y @ lin1_wT + bias1
    bias1 = (conv_b[:, None] * jnp.sum(lin1_wT, axis=0)[None, :]
             + p["lin1_b"][None, :])                           # (SEQ, HID)
    bias1_t = jnp.tile(bias1, (TB, 1))                         # (TB*SEQ, HID)
    # Block-diagonal average-pool matrix: pool[b, b*P_PAD + p] = 1/49 (p < 49).
    eye = jnp.eye(TB, dtype=jnp.float32)
    pmask = (jnp.arange(P_PAD) < P).astype(jnp.float32) * (1.0 / P)
    pool = (eye[:, :, None] * pmask[None, None, :]).reshape(TB, TB * P_PAD)
    return {
        "conv_w": conv_w.astype(jnp.bfloat16),
        "lin1_wT": lin1_pad.astype(jnp.bfloat16),
        "bias1_t": bias1_t.astype(jnp.float32),
        "pool": pool.astype(jnp.bfloat16),
        "ln": jnp.stack([p["ln_g"], p["ln_b"]], axis=0).astype(jnp.float32),
        "lin2_wT": p["lin2_w"].T.astype(jnp.bfloat16),
        "lin2_b": p["lin2_b"][None, :].astype(jnp.float32),
    }


def stub_backbone(imgs, w_stub):
    # Deterministic surrogate for the frozen pretrained resnet_h: average-pool
    # imgs to a 7x7 grid and project 3 -> C_FEAT channels with a fixed 1x1 conv.
    B, Cin, Hs, Ws = imgs.shape
    ph, pw = Hs // 7, Ws // 7
    pooled = imgs.reshape(B, Cin, 7, ph, 7, pw).mean(axis=(3, 5))   # (B, 3, 7, 7)
    return jnp.einsum("oc,bchw->bohw", w_stub, pooled)              # (B, C, 7, 7)


def init_params(key):
    ks = jax.random.split(key, 12)
    f32 = jnp.float32
    p = {}
    p["bn_g"]   = jax.random.normal(ks[0], (C_FEAT,), f32) * 0.1 + 1.0
    p["bn_b"]   = jax.random.normal(ks[1], (C_FEAT,), f32) * 0.1
    p["bn_m"]   = jax.random.normal(ks[2], (C_FEAT,), f32) * 0.1
    p["bn_v"]   = jax.random.uniform(ks[3], (C_FEAT,), f32, 0.5, 1.5)
    p["conv_w"] = jax.random.normal(ks[4], (SEQ, C_FEAT), f32) / jnp.sqrt(C_FEAT)
    p["conv_b"] = jax.random.normal(ks[5], (SEQ,), f32) * 0.02
    p["lin1_w"] = jax.random.normal(ks[6], (HID, P), f32) / jnp.sqrt(P)
    p["lin1_b"] = jax.random.normal(ks[7], (HID,), f32) * 0.02
    p["ln_g"]   = jax.random.normal(ks[8], (C_FEAT,), f32) * 0.1 + 1.0
    p["ln_b"]   = jax.random.normal(ks[9], (C_FEAT,), f32) * 0.1
    p["lin2_w"] = jax.random.normal(ks[10], (HID, C_FEAT), f32) / jnp.sqrt(C_FEAT)
    p["lin2_b"] = jax.random.normal(ks[11], (HID,), f32) * 0.02
    return p


# --------------------------------------------------------------------------
# References
# --------------------------------------------------------------------------
def reference_prepared(hidden_state, kp):
    # Plain-JAX f32 mirror of the kernel math on the same prepared (folded,
    # bf16-quantized) inputs -> tight comparison.
    B = hidden_state.shape[0]
    x = hidden_state.reshape(B, C_FEAT, P).transpose(0, 2, 1)
    x = x.astype(jnp.bfloat16).astype(jnp.float32)                 # (B, P, C)
    convw = kp["conv_w"].astype(jnp.float32)                       # (SEQ, C)
    lin1 = kp["lin1_wT"].astype(jnp.float32)[:P]                   # (P, HID)
    lin2 = kp["lin2_wT"].astype(jnp.float32)                       # (C, HID)
    bias1 = kp["bias1_t"][:SEQ]                                    # (SEQ, HID)

    y = jnp.einsum("sc,bpc->bsp", convw, x, precision=_HIGHEST)
    y = y.astype(jnp.bfloat16).astype(jnp.float32)                 # mirror cast
    z = jnp.einsum("bsp,ph->bsh", y, lin1, precision=_HIGHEST) + bias1[None]
    out1 = _gelu_ref(z)

    pscale = jnp.asarray(1.0 / P, jnp.bfloat16).astype(jnp.float32)
    f = x.sum(axis=1) * pscale                                     # (B, C)
    mu = f.mean(axis=1, keepdims=True)
    var = ((f - mu) ** 2).mean(axis=1, keepdims=True)
    fln = (f - mu) / jnp.sqrt(var + LN_EPS) * kp["ln"][0][None, :] + kp["ln"][1][None, :]
    fln = fln.astype(jnp.bfloat16).astype(jnp.float32)             # mirror cast
    out2 = _gelu_ref(jnp.dot(fln, lin2, precision=_HIGHEST) + kp["lin2_b"])
    return out1, out2


def reference_original(hidden_state, p):
    # Original (unfolded, full-f32) module math -> loose semantic check.
    B = hidden_state.shape[0]
    x = hidden_state.reshape(B, C_FEAT, P)                         # (B, C, P)
    inv = 1.0 / jnp.sqrt(p["bn_v"] + BN_EPS)
    xn = ((x - p["bn_m"][None, :, None]) * (inv * p["bn_g"])[None, :, None]
          + p["bn_b"][None, :, None])
    y = jnp.einsum("sc,bcp->bsp", p["conv_w"], xn,
                   precision=_HIGHEST) + p["conv_b"][None, :, None]
    z = jnp.einsum("bsp,hp->bsh", y, p["lin1_w"],
                   precision=_HIGHEST) + p["lin1_b"][None, None, :]
    out1 = _gelu_ref(z)
    f = x.mean(axis=2)                                             # (B, C)
    mu = f.mean(axis=1, keepdims=True)
    var = ((f - mu) ** 2).mean(axis=1, keepdims=True)
    fln = (f - mu) / jnp.sqrt(var + LN_EPS) * p["ln_g"][None, :] + p["ln_b"][None, :]
    out2 = _gelu_ref(jnp.dot(fln, p["lin2_w"].T,
                             precision=_HIGHEST) + p["lin2_b"][None, :])
    return out1, out2


if __name__ == "__main__":
    key = jax.random.PRNGKey(0)
    k_img, k_stub, k_par = jax.random.split(key, 3)

    B = 16
    imgs = jax.random.normal(k_img, (B, 3, 56, 56), jnp.float32)       # NCHW input
    w_stub = jax.random.normal(k_stub, (C_FEAT, 3), jnp.float32) * 0.5
    params = init_params(k_par)

    hidden_state = stub_backbone(imgs, w_stub)                          # (B, C, 7, 7)
    kparams = fold_params(params)

    out1, out2 = image_model_forward(hidden_state, kparams)
    jax.block_until_ready((out1, out2))

    assert out1.shape == (B, SEQ, HID) and out2.shape == (B, HID)

    # Tight check: kernel vs. f32 reference on the exact same prepared inputs
    # (same bf16 quantization); residual diff = MXU accumulation order + the
    # EUP approximate reciprocal in the erf.
    r1, r2 = reference_prepared(hidden_state, kparams)
    assert jnp.allclose(out1, r1, atol=4e-3, rtol=4e-3)
    assert jnp.allclose(out2, r2, atol=4e-3, rtol=4e-3)

    # Loose check: original (unfolded, full-f32) module semantics.  Accepted
    # approximations: bf16 activations/weights on the MXU, bf16-pooled features
    # for the LayerNorm branch, approximate reciprocal in GELU.
    o1, o2 = reference_original(hidden_state, params)
    assert jnp.allclose(out1, o1, atol=2.5e-2, rtol=2.5e-2)
    assert jnp.allclose(out2, o2, atol=2.5e-2, rtol=2.5e-2)

    print("KERNEL_OK")
</pallas_src>

<mosaic_0001>
module attributes {stable_mosaic.version = 11 : i64} {
  func.func @_image_model_kernel(%arg0: i32, %arg1: memref<512x128xbf16, #tpu.memory_space<vmem>>, %arg2: memref<8x128xbf16, #tpu.memory_space<vmem>>, %arg3: memref<64x128xbf16, #tpu.memory_space<vmem>>, %arg4: memref<64x128xf32, #tpu.memory_space<vmem>>, %arg5: memref<8x512xbf16, #tpu.memory_space<vmem>>, %arg6: memref<2x128xf32, #tpu.memory_space<vmem>>, %arg7: memref<128x128xbf16, #tpu.memory_space<vmem>>, %arg8: memref<1x128xf32, #tpu.memory_space<vmem>>, %arg9: memref<64x128xf32, #tpu.memory_space<vmem>>, %arg10: memref<8x128xf32, #tpu.memory_space<vmem>>) attributes {dimension_semantics = [#tpu.dimension_semantics<parallel>], iteration_bounds = array<i64: 2>, scalar_prefetch = 0 : i64, scratch_operands = 0 : i64, tpu.core_type = #tpu.core_type<tc>, window_params = [{transform_indices = @transform_0, window_bounds = array<i64: 512, 128>}, {pipeline_mode = #tpu.pipeline_mode<synchronous>, transform_indices = @transform_1, window_bounds = array<i64: 8, 128>}, {pipeline_mode = #tpu.pipeline_mode<synchronous>, transform_indices = @transform_2, window_bounds = array<i64: 64, 128>}, {pipeline_mode = #tpu.pipeline_mode<synchronous>, transform_indices = @transform_3, window_bounds = array<i64: 64, 128>}, {pipeline_mode = #tpu.pipeline_mode<synchronous>, transform_indices = @transform_4, window_bounds = array<i64: 8, 512>}, {pipeline_mode = #tpu.pipeline_mode<synchronous>, transform_indices = @transform_5, window_bounds = array<i64: 2, 128>}, {pipeline_mode = #tpu.pipeline_mode<synchronous>, transform_indices = @transform_6, window_bounds = array<i64: 128, 128>}, {pipeline_mode = #tpu.pipeline_mode<synchronous>, transform_indices = @transform_7, window_bounds = array<i64: 1, 128>}, {transform_indices = @transform_8, window_bounds = array<i64: 64, 128>}, {transform_indices = @transform_9, window_bounds = array<i64: 8, 128>}]} {
    %c0 = arith.constant 0 : index
    %c0_0 = arith.constant 0 : index
    %0 = vector.load %arg1[%c0, %c0_0] : memref<512x128xbf16, #tpu.memory_space<vmem>>, vector<512x128xbf16>
    %c0_1 = arith.constant 0 : index
    %c0_2 = arith.constant 0 : index
    %1 = vector.load %arg2[%c0_1, %c0_2] : memref<8x128xbf16, #tpu.memory_space<vmem>>, vector<8x128xbf16>
    %cst = arith.constant dense<0.000000e+00> : vector<8x512xf32>
    %2 = tpu.matmul %1, %0, %cst {dimension_numbers = #tpu.dot_dimension_numbers<[1], [1], [0], [0], [0, 0, 1, 0], [], []>} : vector<8x128xbf16>, vector<512x128xbf16>, vector<8x512xf32> -> vector<8x512xf32>
    %3 = vector.extract_strided_slice %2 {offsets = [0, 0], sizes = [8, 64], strides = [1, 1]} : vector<8x512xf32> to vector<8x64xf32>
    %4 = vector.extract_strided_slice %2 {offsets = [0, 64], sizes = [8, 64], strides = [1, 1]} : vector<8x512xf32> to vector<8x64xf32>
    %5 = vector.extract_strided_slice %2 {offsets = [0, 128], sizes = [8, 64], strides = [1, 1]} : vector<8x512xf32> to vector<8x64xf32>
    %6 = vector.extract_strided_slice %2 {offsets = [0, 192], sizes = [8, 64], strides = [1, 1]} : vector<8x512xf32> to vector<8x64xf32>
    %7 = vector.extract_strided_slice %2 {offsets = [0, 256], sizes = [8, 64], strides = [1, 1]} : vector<8x512xf32> to vector<8x64xf32>
    %8 = vector.extract_strided_slice %2 {offsets = [0, 320], sizes = [8, 64], strides = [1, 1]} : vector<8x512xf32> to vector<8x64xf32>
    %9 = vector.extract_strided_slice %2 {offsets = [0, 384], sizes = [8, 64], strides = [1, 1]} : vector<8x512xf32> to vector<8x64xf32>
    %10 = vector.extract_strided_slice %2 {offsets = [0, 448], sizes = [8, 64], strides = [1, 1]} : vector<8x512xf32> to vector<8x64xf32>
    %11 = tpu.concatenate %3, %4, %5, %6, %7, %8, %9, %10 in 0 : vector<8x64xf32>, vector<8x64xf32>, vector<8x64xf32>, vector<8x64xf32>, vector<8x64xf32>, vector<8x64xf32>, vector<8x64xf32>, vector<8x64xf32> -> vector<64x64xf32>
    %12 = arith.truncf %11 : vector<64x64xf32> to vector<64x64xbf16>
    %c0_3 = arith.constant 0 : index
    %c0_4 = arith.constant 0 : index
    %13 = vector.load %arg3[%c0_3, %c0_4] : memref<64x128xbf16, #tpu.memory_space<vmem>>, vector<64x128xbf16>
    %cst_5 = arith.constant dense<0.000000e+00> : vector<64x128xf32>
    %14 = tpu.matmul %12, %13, %cst_5 {dimension_numbers = #tpu.dot_dimension_numbers<[1], [0], [0], [1], [0, 0, 1, 1], [], []>} : vector<64x64xbf16>, vector<64x128xbf16>, vector<64x128xf32> -> vector<64x128xf32>
    %c0_6 = arith.constant 0 : index
    %c0_7 = arith.constant 0 : index
    %15 = vector.load %arg4[%c0_6, %c0_7] : memref<64x128xf32, #tpu.memory_space<vmem>>, vector<64x128xf32>
    %16 = arith.addf %14, %15 : vector<64x128xf32>
    %cst_8 = arith.constant 5.000000e-01 : f32
    %17 = vector.broadcast %cst_8 : f32 to vector<64x128xf32>
    %18 = arith.mulf %17, %16 : vector<64x128xf32>
    %cst_9 = arith.constant 0.707106769 : f32
    %19 = vector.broadcast %cst_9 : f32 to vector<64x128xf32>
    %20 = arith.mulf %16, %19 : vector<64x128xf32>
    %cst_10 = arith.constant 0.000000e+00 : f32
    %21 = vector.broadcast %cst_10 : f32 to vector<64x128xf32>
    %22 = arith.cmpf oge, %20, %21 : vector<64x128xf32>
    %cst_11 = arith.constant 1.000000e+00 : f32
    %cst_12 = arith.constant -1.000000e+00 : f32
    %23 = vector.broadcast %cst_11 : f32 to vector<64x128xf32>
    %24 = vector.broadcast %cst_12 : f32 to vector<64x128xf32>
    %25 = arith.select %22, %23, %24 : vector<64x128xi1>, vector<64x128xf32>
    %26 = math.absf %20 : vector<64x128xf32>
    %cst_13 = arith.constant 0.327591091 : f32
    %27 = vector.broadcast %cst_13 : f32 to vector<64x128xf32>
    %28 = arith.mulf %27, %26 : vector<64x128xf32>
    %cst_14 = arith.constant 1.000000e+00 : f32
    %29 = vector.broadcast %cst_14 : f32 to vector<64x128xf32>
    %30 = arith.addf %29, %28 : vector<64x128xf32>
    %31 = tpu.reciprocal %30 {approx = true} : vector<64x128xf32> -> vector<64x128xf32>
    %cst_15 = arith.constant 1.06140542 : f32
    %32 = vector.broadcast %cst_15 : f32 to vector<64x128xf32>
    %33 = arith.mulf %32, %31 : vector<64x128xf32>
    %cst_16 = arith.constant -1.45315206 : f32
    %34 = vector.broadcast %cst_16 : f32 to vector<64x128xf32>
    %35 = arith.addf %33, %34 : vector<64x128xf32>
    %36 = arith.mulf %35, %31 : vector<64x128xf32>
    %cst_17 = arith.constant 1.42141378 : f32
    %37 = vector.broadcast %cst_17 : f32 to vector<64x128xf32>
    %38 = arith.addf %36, %37 : vector<64x128xf32>
    %39 = arith.mulf %38, %31 : vector<64x128xf32>
    %cst_18 = arith.constant -0.284496725 : f32
    %40 = vector.broadcast %cst_18 : f32 to vector<64x128xf32>
    %41 = arith.addf %39, %40 : vector<64x128xf32>
    %42 = arith.mulf %41, %31 : vector<64x128xf32>
    %cst_19 = arith.constant 0.254829586 : f32
    %43 = vector.broadcast %cst_19 : f32 to vector<64x128xf32>
    %44 = arith.addf %42, %43 : vector<64x128xf32>
    %45 = arith.mulf %44, %31 : vector<64x128xf32>
    %cst_20 = arith.constant 0.000000e+00 : f32
    %46 = vector.broadcast %cst_20 : f32 to vector<64x128xf32>
    %47 = arith.subf %46, %26 : vector<64x128xf32>
    %48 = arith.mulf %47, %26 : vector<64x128xf32>
    %49 = math.exp %48 : vector<64x128xf32>
    %50 = arith.mulf %45, %49 : vector<64x128xf32>
    %cst_21 = arith.constant 1.000000e+00 : f32
    %51 = vector.broadcast %cst_21 : f32 to vector<64x128xf32>
    %52 = arith.subf %51, %50 : vector<64x128xf32>
    %53 = arith.mulf %25, %52 : vector<64x128xf32>
    %cst_22 = arith.constant 1.000000e+00 : f32
    %54 = vector.broadcast %cst_22 : f32 to vector<64x128xf32>
    %55 = arith.addf %54, %53 : vector<64x128xf32>
    %56 = arith.mulf %18, %55 : vector<64x128xf32>
    %c0_23 = arith.constant 0 : index
    %c0_24 = arith.constant 0 : index
    %57 = vector.load %arg9[%c0_23, %c0_24] : memref<64x128xf32, #tpu.memory_space<vmem>>, vector<64x128xf32>
    tpu.vector_store %arg9[%c0_23, %c0_24], %56 {strides = array<i32>} : memref<64x128xf32, #tpu.memory_space<vmem>>, vector<64x128xf32>,
    %c0_25 = arith.constant 0 : index
    %c0_26 = arith.constant 0 : index
    %58 = vector.load %arg5[%c0_25, %c0_26] : memref<8x512xbf16, #tpu.memory_space<vmem>>, vector<8x512xbf16>
    %cst_27 = arith.constant dense<0.000000e+00> : vector<8x128xf32>
    %59 = tpu.matmul %58, %0, %cst_27 {dimension_numbers = #tpu.dot_dimension_numbers<[1], [0], [0], [1], [0, 0, 1, 1], [], []>} : vector<8x512xbf16>, vector<512x128xbf16>, vector<8x128xf32> -> vector<8x128xf32>
    %cst_28 = arith.constant dense<0.000000e+00> : vector<8xf32>
    %60 = vector.multi_reduction <add>, %59, %cst_28 [1] : vector<8x128xf32> to vector<8xf32>
    %61 = vector.shape_cast %60 : vector<8xf32> to vector<8x1xf32>
    %cst_29 = arith.constant 1.280000e+02 : f32
    %62 = vector.broadcast %cst_29 : f32 to vector<8x1xf32>
    %63 = arith.divf %61, %62 : vector<8x1xf32>
    %64 = vector.broadcast %63 : vector<8x1xf32> to vector<8x128xf32>
    %65 = arith.subf %59, %64 : vector<8x128xf32>
    %66 = arith.mulf %65, %65 : vector<8x128xf32>
    %cst_30 = arith.constant dense<0.000000e+00> : vector<8xf32>
    %67 = vector.multi_reduction <add>, %66, %cst_30 [1] : vector<8x128xf32> to vector<8xf32>
    %68 = vector.shape_cast %67 : vector<8xf32> to vector<8x1xf32>
    %cst_31 = arith.constant 1.280000e+02 : f32
    %69 = vector.broadcast %cst_31 : f32 to vector<8x1xf32>
    %70 = arith.divf %68, %69 : vector<8x1xf32>
    %c0_32 = arith.constant 0 : index
    %c0_33 = arith.constant 0 : index
    %71 = vector.load %arg6[%c0_32, %c0_33] : memref<2x128xf32, #tpu.memory_space<vmem>>, vector<2x128xf32>
    %72 = vector.broadcast %63 : vector<8x1xf32> to vector<8x128xf32>
    %73 = arith.subf %59, %72 : vector<8x128xf32>
    %cst_34 = arith.constant 9.99999974E-6 : f32
    %74 = vector.broadcast %cst_34 : f32 to vector<8x1xf32>
    %75 = arith.addf %70, %74 : vector<8x1xf32>
    %76 = math.rsqrt %75 : vector<8x1xf32>
    %77 = vector.broadcast %76 : vector<8x1xf32> to vector<8x128xf32>
    %78 = arith.mulf %73, %77 : vector<8x128xf32>
    %79 = vector.extract_strided_slice %71 {offsets = [0, 0], sizes = [1, 128], strides = [1, 1]} : vector<2x128xf32> to vector<1x128xf32>
    %80 = vector.broadcast %79 : vector<1x128xf32> to vector<8x128xf32>
    %81 = arith.mulf %78, %80 : vector<8x128xf32>
    %82 = vector.extract_strided_slice %71 {offsets = [1, 0], sizes = [1, 128], strides = [1, 1]} : vector<2x128xf32> to vector<1x128xf32>
    %83 = vector.broadcast %82 : vector<1x128xf32> to vector<8x128xf32>
    %84 = arith.addf %81, %83 : vector<8x128xf32>
    %85 = arith.truncf %84 : vector<8x128xf32> to vector<8x128xbf16>
    %c0_35 = arith.constant 0 : index
    %c0_36 = arith.constant 0 : index
    %86 = vector.load %arg7[%c0_35, %c0_36] : memref<128x128xbf16, #tpu.memory_space<vmem>>, vector<128x128xbf16>
    %cst_37 = arith.constant dense<0.000000e+00> : vector<8x128xf32>
    %87 = tpu.matmul %85, %86, %cst_37 {dimension_numbers = #tpu.dot_dimension_numbers<[1], [0], [0], [1], [0, 0, 1, 1], [], []>} : vector<8x128xbf16>, vector<128x128xbf16>, vector<8x128xf32> -> vector<8x128xf32>
    %c0_38 = arith.constant 0 : index
    %c0_39 = arith.constant 0 : index
    %88 = vector.load %arg8[%c0_38, %c0_39] : memref<1x128xf32, #tpu.memory_space<vmem>>, vector<1x128xf32>
    %89 = vector.broadcast %88 : vector<1x128xf32> to vector<8x128xf32>
    %90 = arith.addf %87, %89 : vector<8x128xf32>
    %cst_40 = arith.constant 5.000000e-01 : f32
    %91 = vector.broadcast %cst_40 : f32 to vector<8x128xf32>
    %92 = arith.mulf %91, %90 : vector<8x128xf32>
    %cst_41 = arith.constant 0.707106769 : f32
    %93 = vector.broadcast %cst_41 : f32 to vector<8x128xf32>
    %94 = arith.mulf %90, %93 : vector<8x128xf32>
    %cst_42 = arith.constant 0.000000e+00 : f32
    %95 = vector.broadcast %cst_42 : f32 to vector<8x128xf32>
    %96 = arith.cmpf oge, %94, %95 : vector<8x128xf32>
    %cst_43 = arith.constant 1.000000e+00 : f32
    %cst_44 = arith.constant -1.000000e+00 : f32
    %97 = vector.broadcast %cst_43 : f32 to vector<8x128xf32>
    %98 = vector.broadcast %cst_44 : f32 to vector<8x128xf32>
    %99 = arith.select %96, %97, %98 : vector<8x128xi1>, vector<8x128xf32>
    %100 = math.absf %94 : vector<8x128xf32>
    %cst_45 = arith.constant 0.327591091 : f32
    %101 = vector.broadcast %cst_45 : f32 to vector<8x128xf32>
    %102 = arith.mulf %101, %100 : vector<8x128xf32>
    %cst_46 = arith.constant 1.000000e+00 : f32
    %103 = vector.broadcast %cst_46 : f32 to vector<8x128xf32>
    %104 = arith.addf %103, %102 : vector<8x128xf32>
    %105 = tpu.reciprocal %104 {approx = true} : vector<8x128xf32> -> vector<8x128xf32>
    %cst_47 = arith.constant 1.06140542 : f32
    %106 = vector.broadcast %cst_47 : f32 to vector<8x128xf32>
    %107 = arith.mulf %106, %105 : vector<8x128xf32>
    %cst_48 = arith.constant -1.45315206 : f32
    %108 = vector.broadcast %cst_48 : f32 to vector<8x128xf32>
    %109 = arith.addf %107, %108 : vector<8x128xf32>
    %110 = arith.mulf %109, %105 : vector<8x128xf32>
    %cst_49 = arith.constant 1.42141378 : f32
    %111 = vector.broadcast %cst_49 : f32 to vector<8x128xf32>
    %112 = arith.addf %110, %111 : vector<8x128xf32>
    %113 = arith.mulf %112, %105 : vector<8x128xf32>
    %cst_50 = arith.constant -0.284496725 : f32
    %114 = vector.broadcast %cst_50 : f32 to vector<8x128xf32>
    %115 = arith.addf %113, %114 : vector<8x128xf32>
    %116 = arith.mulf %115, %105 : vector<8x128xf32>
    %cst_51 = arith.constant 0.254829586 : f32
    %117 = vector.broadcast %cst_51 : f32 to vector<8x128xf32>
    %118 = arith.addf %116, %117 : vector<8x128xf32>
    %119 = arith.mulf %118, %105 : vector<8x128xf32>
    %cst_52 = arith.constant 0.000000e+00 : f32
    %120 = vector.broadcast %cst_52 : f32 to vector<8x128xf32>
    %121 = arith.subf %120, %100 : vector<8x128xf32>
    %122 = arith.mulf %121, %100 : vector<8x128xf32>
    %123 = math.exp %122 : vector<8x128xf32>
    %124 = arith.mulf %119, %123 : vector<8x128xf32>
    %cst_53 = arith.constant 1.000000e+00 : f32
    %125 = vector.broadcast %cst_53 : f32 to vector<8x128xf32>
    %126 = arith.subf %125, %124 : vector<8x128xf32>
    %127 = arith.mulf %99, %126 : vector<8x128xf32>
    %cst_54 = arith.constant 1.000000e+00 : f32
    %128 = vector.broadcast %cst_54 : f32 to vector<8x128xf32>
    %129 = arith.addf %128, %127 : vector<8x128xf32>
    %130 = arith.mulf %92, %129 : vector<8x128xf32>
    %c0_55 = arith.constant 0 : index
    %c0_56 = arith.constant 0 : index
    %131 = vector.load %arg10[%c0_55, %c0_56] : memref<8x128xf32, #tpu.memory_space<vmem>>, vector<8x128xf32>
    tpu.vector_store %arg10[%c0_55, %c0_56], %130 {strides = array<i32>} : memref<8x128xf32, #tpu.memory_space<vmem>>, vector<8x128xf32>,
    return
  }
  func.func @transform_0(%arg0: i32) -> (i32, i32) {
    %c0_i32 = arith.constant 0 : i32
    %c0_i32_0 = arith.constant 0 : i32
    return %arg0, %c0_i32 : i32, i32
  }
  func.func @transform_1(%arg0: i32) -> (i32, i32) {
    %c0_i32 = arith.constant 0 : i32
    %c0_i32_0 = arith.constant 0 : i32
    %c0_i32_1 = arith.constant 0 : i32
    return %c0_i32, %c0_i32_0 : i32, i32
  }
  func.func @transform_2(%arg0: i32) -> (i32, i32) {
    %c0_i32 = arith.constant 0 : i32
    %c0_i32_0 = arith.constant 0 : i32
    %c0_i32_1 = arith.constant 0 : i32
    return %c0_i32, %c0_i32_0 : i32, i32
  }
  func.func @transform_3(%arg0: i32) -> (i32, i32) {
    %c0_i32 = arith.constant 0 : i32
    %c0_i32_0 = arith.constant 0 : i32
    %c0_i32_1 = arith.constant 0 : i32
    return %c0_i32, %c0_i32_0 : i32, i32
  }
  func.func @transform_4(%arg0: i32) -> (i32, i32) {
    %c0_i32 = arith.constant 0 : i32
    %c0_i32_0 = arith.constant 0 : i32
    %c0_i32_1 = arith.constant 0 : i32
    return %c0_i32, %c0_i32_0 : i32, i32
  }
  func.func @transform_5(%arg0: i32) -> (i32, i32) {
    %c0_i32 = arith.constant 0 : i32
    %c0_i32_0 = arith.constant 0 : i32
    %c0_i32_1 = arith.constant 0 : i32
    return %c0_i32, %c0_i32_0 : i32, i32
  }
  func.func @transform_6(%arg0: i32) -> (i32, i32) {
    %c0_i32 = arith.constant 0 : i32
    %c0_i32_0 = arith.constant 0 : i32
    %c0_i32_1 = arith.constant 0 : i32
    return %c0_i32, %c0_i32_0 : i32, i32
  }
  func.func @transform_7(%arg0: i32) -> (i32, i32) {
    %c0_i32 = arith.constant 0 : i32
    %c0_i32_0 = arith.constant 0 : i32
    %c0_i32_1 = arith.constant 0 : i32
    return %c0_i32, %c0_i32_0 : i32, i32
  }
  func.func @transform_8(%arg0: i32) -> (i32, i32) {
    %c0_i32 = arith.constant 0 : i32
    %c0_i32_0 = arith.constant 0 : i32
    return %arg0, %c0_i32 : i32, i32
  }
  func.func @transform_9(%arg0: i32) -> (i32, i32) {
    %c0_i32 = arith.constant 0 : i32
    %c0_i32_0 = arith.constant 0 : i32
    return %arg0, %c0_i32 : i32, i32
  }
}

</mosaic_0001>

<bundles_post_ra>
// kernel: tpu_custom_call.1
= control target key start
LH: loop header
LB: loop body
LE: loop exit
PB: predicated region body
PF: predicated region fallthrough
CT: control target
= control target key end

     0   :  { %s2871_s0 = inlined_call_operand.hbm [shape: bf16[1024,128], index: 0, kind: input, shape index: {}]   ;;  %s2872_s1 = inlined_call_operand.hbm [shape: bf16[8,128], index: 1, kind: input, shape index: {}]   ;;  %s2873_s2 = inlined_call_operand.hbm [shape: bf16[64,128], index: 2, kind: input, shape index: {}]   ;;  %s2874_s3 = inlined_call_operand.hbm [shape: f32[64,128], index: 3, kind: input, shape index: {}]   ;;  %s2875_s4 = inlined_call_operand.hbm [shape: bf16[8,512], index: 4, kind: input, shape index: {}]   ;;  %s2876_s5 = inlined_call_operand.vmem [shape: f32[2,128], index: 5, kind: input, shape index: {}]   ;;  %s2877_s6 = inlined_call_operand.hbm [shape: bf16[128,128], index: 6, kind: input, shape index: {}]   ;;  %s2878_s7 = inlined_call_operand.vmem [shape: f32[1,128], index: 7, kind: input, shape index: {}]   ;;  %s2879_s8 = inlined_call_operand.hbm [shape: f32[128,128], index: 8, kind: output, shape index: {0}]   ;;  %s2880_s9 = inlined_call_operand.hbm [shape: f32[16,128], index: 9, kind: output, shape index: {1}]  }
   0x1   :  { %2887 = sst [smem:[#allocation22_spill]] %s2872_s1 }
   0x2   :  { %2888 = sst [smem:[#allocation23_spill]] %s2873_s2 }
   0x3   :  { %2889 = sst [smem:[#allocation24_spill]] %s2874_s3 }
   0x4   :  { %15 = vsyncpa [#allocation3], 0 }
   0x5   :  { %17 = vsyncpa [#allocation3 + $0x1], 0 }
   0x6   :  { %18 = vsyncpa [#allocation6], 0 }
   0x7   :  { %19 = vsyncpa [#allocation9], 0 }
   0x8   :  { %20 = vsyncpa [#allocation12], 0 }
   0x9   :  { %21 = vsyncpa [#allocation4], 0 }
   0xa   :  { %23 = vsyncpa [#allocation4 + $0x1], 0 }
   0xb   :  { %24 = vsyncpa [#allocation15], 0 }
   0xc   :  { %26 = vsyncpa [#allocation15 + $0x1], 0  ;;  %s2327_s30 = smov 0   ;;  %s2329_s10 = smov 0  }
   0xd   :  { %s2331_s11 = smov 0   ;;  %s2333_s12 = smov 0  }
   0xe LB: > { %s2259_s13 = smov [#allocation5]   ;;  %s2348_s15 = sadd.s32 4294967295, %s2257_s12   ;;  %s2257_s12 = sphi %s2333_s12, %s2917_s12   ;;  %s2253_s11 = sphi %s2331_s11, %s2916_s11   ;;  %s2249_s10 = sphi %s2329_s10, %s2915_s10   ;;  %s2245_s30 = sphi %s2327_s30, %s2914_s30  }
   0xf   : > { %s275_s14 = sshll.u32 %s2259_s13, 4  ;;  %p1571_p0 = scmp.ge.s32.totalorder %s2257_s12, 1  ;;  %s276_s14 = int_to_ptr.vmem [resolvable:$true] %s275_s14 }
  0x10   : > { %p2881_p1 = scmp.eq.s32.totalorder %s2348_s15, 0  ;;  %p262_p2 = scmp.lt.s32.totalorder %s2257_s12, 3 }
  0x11   : > { %s2260_s17 = smov [#allocation8]   ;;  %s2261_s20 = smov [#allocation7]  }
  0x12   : > { %p2353_p3 = pnand %p1571_p0, %p262_p2  ;;  %s298_s18 = sshll.u32 %s2260_s17, 4  ;;  %s2360_s18 = int_to_ptr.vmem [resolvable:$true] %s298_s18 }
  0x13   : > { %s285_s21 = sshll.u32 %s2261_s20, 4  ;;  %s2004_s23 = scalar_lea.vmem %s276_s14, 64  ;;  %s2368_s21 = int_to_ptr.vmem [resolvable:$true] %s285_s21 }
  0x14   : > { %s2890_s16 = scalar_select %p2353_p3, 1, 0 }
  0x15   : > { %p1811_p5 = pneg %p2353_p3  ;;  %p2005_p8 = scmp.ne.s32.totalorder %s276_s14, %s2004_s23 }
  0x16   : > { %p2012_p11 = scmp.lt.s32.totalorder %s276_s14, %s276_s14  ;;  %p2013_p12 = scmp.lt.s32.totalorder %s2004_s23, %s2004_s23 }
  0x17   : > { %p2364_p6 = pnand %p1811_p5, %p2881_p1 }
  0x18   : > { %p2014_p13 = por %p2013_p12, %p2012_p11 }
  0x19   : > { %p2372_p7 = pneg %p2364_p6 }
  0x1b   : > { %p2007_p9 = pnand %p2005_p8, %p2372_p7 }
  0x1d   : > { %p2008_p10 = pneg %p2007_p9 }
  0x1f   : > { %p2015_p0 = pnand %p2014_p13, %p2008_p10 }
  0x21   : > { %2018 = shalt.err (!%p2015_p0)
}
  0x22   : > { %s2893_s1 = sld [smem:[#allocation22_spill]]  ;;  %s2030_s26 = scalar_lea.vmem %s2360_s18, 1024 }
  0x23   : > { %p2031_p2 = scmp.ne.s32.totalorder %s2360_s18, %s2030_s26  ;;  %p2038_p9 = scmp.lt.s32.totalorder %s2360_s18, %s2360_s18 }
  0x24   : > { %p2039_p11 = scmp.lt.s32.totalorder %s2030_s26, %s2030_s26 }
  0x25   : > { %p2033_p5 = pnand %p2031_p2, %p2372_p7 }
  0x26   : > { %p2040_p10 = por %p2039_p11, %p2038_p9 }
  0x27   : > { %p2034_p8 = pneg %p2033_p5 }
  0x28   : > { %1814 = dma.hbm_to_vmem [thread:$0]  (!%p2364_p6), %s2893_s1, 64, %s276_s14, [#allocation6]  }
  0x29   : > { %p2041_p12 = pnand %p2040_p10, %p2034_p8 }
  0x2b   : > { %2044 = shalt.err (!%p2041_p12)
}
  0x2c   : > { %s2262_s27 = smov 128   ;;  %s2263_s28 = smov 8  }
  0x2d   : > { %s2894_s3 = sld [smem:[#allocation24_spill]]  ;;  %s2056_s14 = scalar_lea.vmem %s2368_s21, 512 }
  0x2e   : > { %p2057_p13 = scmp.ne.s32.totalorder %s2368_s21, %s2056_s14  ;;  %p2064_p5 = scmp.lt.s32.totalorder %s2368_s21, %s2368_s21 }
  0x2f   : > { %p2065_p8 = scmp.lt.s32.totalorder %s2056_s14, %s2056_s14 }
  0x30   : > { %p2059_p0 = pnand %p2057_p13, %p2372_p7 }
  0x31   : > { %p2066_p9 = por %p2065_p8, %p2064_p5 }
  0x32   : > { %p2060_p2 = pneg %p2059_p0 }
  0x33   : > { %1820 = dma.hbm_to_vmem [thread:$0]  (!%p2364_p6), %s2894_s3, 1024, %s2360_s18, [#allocation9], %s2262_s27, %s2262_s27, %s2263_s28  }
  0x34   : > { %p2067_p11 = pnand %p2066_p9, %p2060_p2 }
  0x36   : > { %2070 = shalt.err (!%p2067_p11)
}
  0x37   : > { %s2883_s17 = smov 64   ;;  %s2884_s20 = smov 4  }
  0x38   : > { %s2895_s2 = sld [smem:[#allocation23_spill]]  ;;  %s2266_s24 = smov [#allocation10]  }
  0x39   : > { %s312_s25 = sshll.u32 %s2266_s24, 4  ;;  %s2267_s26 = smov [#allocation11]   ;;  %s313_s25 = int_to_ptr.vmem [resolvable:$true] %s312_s25 }
  0x3a   : > { %s325_s27 = sshll.u32 %s2267_s26, 4  ;;  %s2082_s28 = scalar_lea.vmem %s313_s25, 256  ;;  %s326_s27 = int_to_ptr.vmem [resolvable:$true] %s325_s27 }
  0x3b   : > { %p2083_p10 = scmp.ne.s32.totalorder %s313_s25, %s2082_s28  ;;  %p2090_p0 = scmp.lt.s32.totalorder %s313_s25, %s313_s25 }
  0x3c   : > { %p2091_p2 = scmp.lt.s32.totalorder %s2082_s28, %s2082_s28 }
  0x3d   : > { %p2085_p12 = pnand %p2083_p10, %p2372_p7 }
  0x3e   : > { %1817 = dma.hbm_to_vmem [thread:$0]  (!%p2364_p6), %s2895_s2, 512, %s2368_s21, [#allocation6], %s2883_s17, %s2883_s17, %s2884_s20  }
  0x3f   : > { %p2086_p13 = pneg %p2085_p12  ;;  %p2092_p5 = por %p2091_p2, %p2090_p0 }
  0x41   : > { %p2093_p8 = pnand %p2092_p5, %p2086_p13 }
  0x43   : > { %2096 = shalt.err (!%p2093_p8)
}
  0x44   : > { %1823 = dma.hbm_to_vmem [thread:$0]  (!%p2364_p6), %s2875_s4, 256, %s313_s25, [#allocation9]  }
  0x45   : > { %s2108_s21 = scalar_lea.vmem %s326_s27, 1024  ;;  %p2116_p10 = scmp.lt.s32.totalorder %s326_s27, %s326_s27 }
  0x46   : > { %p2109_p9 = scmp.ne.s32.totalorder %s326_s27, %s2108_s21  ;;  %p2117_p12 = scmp.lt.s32.totalorder %s2108_s21, %s2108_s21 }
  0x48   : > { %p2111_p11 = pnand %p2109_p9, %p2372_p7  ;;  %p2118_p1 = por %p2117_p12, %p2116_p10 }
  0x4a   : > { %p2112_p4 = pneg %p2111_p11 }
  0x4c   : > { %p2119_p3 = pnand %p2118_p1, %p2112_p4 }
  0x4e   : > { %2122 = shalt.err (!%p2119_p3)
}
  0x4f   : > { %1826 = dma.hbm_to_vmem [thread:$0]  (!%p2364_p6), %s2877_s6, 1024, %s326_s27, [#allocation12], %s2883_s17, %s2883_s17, %s2884_s20  }
  0x50   : > { %s1570_s19 = sadd.s32 4294967294, %s2257_s12   ;;  %s2429_s22 = sadd.s32 1, %s2257_s12  }
  0x51   : > { %s39_s23 = sadd.s32 1, %s2253_s11  ;;  %s36_s24 = ssub.s32 %s2257_s12, %s2429_s22 }
  0x52   : > { %p46_p1 = scmp.ne.s32.totalorder %s2253_s11, %s2249_s10  ;;  %p37_p3 = scmp.eq.s32.totalorder %s36_s24, 0 }
  0x53   : > { %p47_p4 = scmp.eq.s32.totalorder %s2257_s12, 0  ;;  %p52_p7 = scmp.ne.s32.totalorder %s2249_s10, %s2245_s30 }
  0x54   : > { %p223_p13 = scmp.eq.s32.totalorder %s2348_s15, 1  ;;  %p2896_p2 = scmp.eq.s32.totalorder %s2348_s15, 0 }
  0x55   : > { %s2441_s25 = scalar_select %p37_p3, %s2253_s11, %s39_s23  }
  0x56   : > { %p48_p0 = por %p47_p4, %p46_p1  ;;  %p2445_p5 = por %p2896_p2, %p52_p7 }
  0x57   : > { %p2449_p6 = por %p223_p13, %p46_p1  ;;  %p229_p8 = scmp.eq.s32.totalorder %s1570_s19, 1 }
  0x58   : > { %s2897_s26 = scalar_select %p2445_p5, 1, 0 }
  0x59   : > { %s2898_s27 = scalar_select %p2449_p6, 1, 0 }
  0x5a   : > { %p1843_p9 = scmp.lt.s32.totalorder %s2257_s12, 2  ;;  %s342_s28 = sand.u32 1, %s2253_s11  }
  0x5b   : > { %p2455_p11 = por %p229_p8, %p52_p7  ;;  %s1578_s13 = sshll.u32 %s342_s28, 8 }
  0x5c   : > { %s1650_s21 = sshll.u32 %s2257_s12, 12  ;;  %s346_s24 = scalar_lea.vmem [#allocation2], %s1578_s13 }
  0x5d   : > { %s2899_s29 = scalar_select %p2455_p11, 1, 0 }
  0x5e   : > { %s2463_s23 = scalar_lea.hbm %s2871_s0, %s1650_s21  ;;  %s353_s17 = sshll.u32 %s346_s24, 4  ;;  %s2469_s17 = int_to_ptr.vmem [resolvable:$true] %s353_s17 }
  0x5f   : > { %p2465_p10 = pnand %p1843_p9, %p48_p0  ;;  %s2471_s20 = scalar_lea.sflag [#allocation3], %s342_s28 }
  0x60   : > { %s2123_s1 = scalar_lea.hbm %s2463_s23, 4096  ;;  %s2128_s13 = scalar_lea.hbm %s2871_s0, 8192 }
  0x61   : > { %p2124_p12 = scmp.ne.s32.totalorder %s2463_s23, %s2123_s1  ;;  %p2125_p1 = pneg %p2465_p10 }
  0x62   : > { %p2129_p7 = scmp.lt.s32.totalorder %s2463_s23, %s2871_s0  ;;  %p2130_p13 = scmp.lt.s32.totalorder %s2128_s13, %s2123_s1 }
  0x63   : > { %p2126_p3 = pnand %p2125_p1, %p2124_p12 }
  0x64   : > { %p2131_p0 = por %p2130_p13, %p2129_p7 }
  0x65   : > { %p2127_p4 = pneg %p2126_p3 }
  0x67   : > { %p2132_p2 = pnand %p2131_p0, %p2127_p4 }
  0x69   : > { %2135 = shalt.err (!%p2132_p2)
}
  0x6a   : > { %s2136_s28 = scalar_lea.vmem %s2469_s17, 4096  ;;  %s2268_s2 = smov [#allocation2]  }
  0x6b   : > { %p2137_p8 = scmp.ne.s32.totalorder %s2469_s17, %s2136_s28  ;;  %s2141_s3 = sshll.u32 %s2268_s2, 4  ;;  %s2142_s3 = int_to_ptr.vmem [resolvable:$false] %s2141_s3 }
  0x6c   : > { %s2143_s21 = scalar_lea.vmem %s2142_s3, 8192  ;;  %p2144_p3 = scmp.lt.s32.totalorder %s2469_s17, %s2142_s3 }
  0x6d   : > { %p2139_p9 = pnand %p2137_p8, %p2125_p1  ;;  %p2145_p11 = scmp.lt.s32.totalorder %s2143_s21, %s2136_s28 }
  0x6f   : > { %p2140_p12 = pneg %p2139_p9  ;;  %p2146_p6 = por %p2145_p11, %p2144_p3 }
  0x71   : > { %p2147_p5 = pnand %p2146_p6, %p2140_p12 }
  0x73   : > { %2150 = shalt.err (!%p2147_p5)
}
  0x74   : > { %s2901_s1 = smov 4   ;;  %s2902_s14 = smov 64  }
  0x75   : > { %1830 = dma.hbm_to_vmem [thread:$0]  (!%p2465_p10), %s2463_s23, 4096, %s2469_s17, %s2471_s20, %s2902_s14, %s2902_s14, %s2901_s1  }
  0x76   : > { %p2903_p1 = scmp.ne.s32.totalorder %s2890_s16, 0 }
  0x77   : > { %s2498_s2 = sand.u32 (!%p2903_p1), 1, %s2249_s10   ;;  %p2904_p5 = scmp.ne.s32.totalorder (!%p2903_p1), %s2897_s26, 0 }
  0x78   : > { %365 = sbr.rel (%p2903_p1) target bundleno = 1315 (0x523), region = 52  ;;  %s1582_s3 = sshll.u32 (!%p2903_p1), %s2498_s2, 8 }
  0x79   : > { %s368_s13 = scalar_lea.sflag (!%p2903_p1), [#allocation3], %s2498_s2  ;;  %s2502_s18 = scalar_lea.vmem (!%p2903_p1), [#allocation2], %s1582_s3 }
  0x7d   : > { %2220 = dma.done.wait (%p2904_p5), %s368_s13, 4096  }
  0x7e   : > { %2222 = vsyncadd (%p2904_p5), %s368_s13, 4294963200  ;;  %p2905_p6 = scmp.eq.s32.totalorder %s2348_s15, 0 }
  0x80   : > { %2224 = dma.done.wait (%p2905_p6), [#allocation6], 576   ;;  %p2906_p11 = pmov %p2905_p6 }
  0x81   : > { %p2907_p10 = pmov %p2905_p6 }
  0x82   : > { %2226 = vsyncadd (%p2906_p11), [#allocation6], 4294966720 }
  0x83   : > { %2228 = dma.done.wait (%p2907_p10), [#allocation9], 1280   ;;  %p2908_p4 = pmov %p2905_p6 }
  0x85   : > { %2230 = vsyncadd (%p2908_p4), [#allocation9], 4294966016  ;;  %p2909_p7 = pmov %p2908_p4 }
  0x86   : > { %p2910_p13 = pmov %p2908_p4 }
  0x87   : > { %2232 = dma.done.wait (%p2909_p7), [#allocation12], 1024  }
  0x88   : > { %2234 = vsyncadd (%p2910_p13), [#allocation12], 4294966272  ;;  %v2521_v0 = vld [vmem:[%s2502_s18 + $0x78] sm:$0xff]   ;;  %v2536_v4 = vld [vmem:[%s2502_s18 + $0x70] sm:$0xff]   ;;  %s2269_s16 = smov 64   ;;  %vm833_vm0 = vcmask 523264  }
  0x89   : > { %v2524_v1 = vld [vmem:[%s2502_s18 + $0x38] sm:$0xff]   ;;  %1652 = vmatprep.subr.bf16.mxu0 %v2521_v0  ;;  %v2541_v5 = vld [vmem:[%s2502_s18 + $0xf0] sm:$0xff]   ;;  %v1915_v7 = vld [vmem:[%s2502_s18 + $0x68] sm:$0xff]   ;;  %s1588_s17 = sshll.u32 %s2498_s2, 6  ;;  %vm2272_vm9 = vmmov 0   ;;  %s1651_s19 = sshll.u32 %s2348_s15, 10 }
  0x8a   : > { %v2528_v2 = vld [vmem:[%s2502_s18 + $0xf8] sm:$0xff]   ;;  %1653 = vmatpush3.bf16.xpose.msra.mxu0 %v2524_v1  ;;  %v1912_v6 = vld [vmem:[%s2502_s18 + $0x30] sm:$0xff]   ;;  %v2550_v9 = vld [vmem:[%s2502_s18 + $0xe8] sm:$0xff]   ;;  %s2750_s20 = scalar_lea.vmem [#allocation13], %s1588_s17  ;;  %s2803_s21 = scalar_lea.hbm %s2879_s8, %s1651_s19 }
  0x8b   : > { %v2532_v3 = vld [vmem:[%s2502_s18 + $0xb8] sm:$0xff]   ;;  %1670 = vmatprep.subr.bf16.mxu1 %v2528_v2  ;;  %1654 = vmatprep.subr.bf16.mxu0 %v2536_v4  ;;  %v2547_v8 = vld [vmem:[%s2502_s18 + $0xb0] sm:$0xff]   ;;  %v1916_v10 = vld [vmem:[%s2502_s18 + $0x28] sm:$0xff]   ;;  %s1404_s1 = sshll.u32 %s2750_s20, 4  ;;  %s1386_s14 = scalar_lea.sflag [#allocation4], %s2498_s2  ;;  %s2806_s1 = int_to_ptr.vmem [resolvable:$true] %s1404_s1 }
  0x8c   : > { %1671 = vmatpush3.bf16.xpose.msra.mxu1 %v2532_v3  ;;  %v1919_v11 = vld [vmem:[%s2502_s18 + $0x60] sm:$0xff]   ;;  %v2557_v12 = vld [vmem:[%s2502_s18 + $0xa8] sm:$0xff]   ;;  %v1923_v15 = vld [vmem:[%s2502_s18 + $0x58] sm:$0xff]   ;;  %s2151_s3 = scalar_lea.vmem %s2806_s1, 1024  ;;  %p2911_p2 = scmp.ne.s32.totalorder %s2898_s27, 0 }
  0x8d   : > { %1672 = vmatprep.subr.bf16.mxu1 %v2541_v5  ;;  %v2560_v13 = vld [vmem:[%s2502_s18 + $0xe0] sm:$0xff]   ;;  %v2570_v17 = vld [vmem:[%s2502_s18 + $0xd8] sm:$0xff]   ;;  %v1927_v20 = vld [vmem:[%s2502_s18 + $0x50] sm:$0xff]   ;;  %p2152_p0 = scmp.ne.s32.totalorder %s2806_s1, %s2151_s3  ;;  %s2273_s13 = smov [#allocation13]  }
  0x8e   : > { %v1920_v14 = vld [vmem:[%s2502_s18 + $0x20] sm:$0xff]   ;;  %v1924_v18 = vld [vmem:[%s2502_s18 + $0x18] sm:$0xff]   ;;  %v2580_v21 = vld [vmem:[%s2502_s18 + $0xd0] sm:$0xff]  }
  0x8f   : > { %v2567_v16 = vld [vmem:[%s2502_s18 + $0xa0] sm:$0xff]   ;;  %v2576_v19 = vld [vmem:[%s2502_s18 + $0x98] sm:$0xff]   ;;  %v1928_v23 = vld [vmem:[%s2502_s18 + $0x10] sm:$0xff]   ;;  %p2153_p8 = pnand %p2152_p0, %p2911_p2 }
  0x90   : > { %v498_v22 = vld [vmem:[#allocation5] sm:$0xf]  ;;  %v1931_v24 = vld [vmem:[%s2502_s18 + $0x48] sm:$0xff]   ;;  %v2587_v25 = vld [vmem:[%s2502_s18 + $0x90] sm:$0xff]  }
  0x91   : > { %1668 = vmatprep.mubr.bf16.mxu0 %v498_v22  ;;  %1686 = vmatprep.mubr.bf16.mxu1 %v498_v22  ;;  %v2590_v26 = vld [vmem:[%s2502_s18 + $0xc8] sm:$0xff]   ;;  %v1935_v28 = vld [vmem:[%s2502_s18 + $0x40] sm:$0xff]   ;;  %v1940_v34 = vld [vmem:[#allocation7 + $0x10] sm:$0xff]   ;;  %p2154_p9 = pneg %p2153_p8 }
  0x92   : > { %1655 = vmatpush3.bf16.xpose.msra.mxu0 %v1912_v6  ;;  %v1932_v27 = vld [vmem:[%s2502_s18 + $0x8] sm:$0xff]   ;;  %v2600_v30 = vld [vmem:[%s2502_s18 + $0xc0] sm:$0xff]  }
  0x93   : > { %1656 = vmatprep.subr.bf16.mxu0 %v1915_v7  ;;  %v2597_v29 = vld [vmem:[%s2502_s18 + $0x88] sm:$0xff]   ;;  %v1936_v31 = vld [vmem:[%s2502_s18] sm:$0xff]  }
  0x94   : > { %1673 = vmatpush3.bf16.xpose.msra.mxu1 %v2547_v8  ;;  %v2606_v32 = vld [vmem:[%s2502_s18 + $0x80] sm:$0xff]   ;;  %v1941_v35 = vld [vmem:[#allocation7 + $0x8] sm:$0xff]   ;;  %s2155_s18 = sshll.u32 %s2273_s13, 4  ;;  %s2156_s18 = int_to_ptr.vmem [resolvable:$false] %s2155_s18 }
  0x95   : > { %1674 = vmatprep.subr.bf16.mxu1 %v2550_v9  ;;  %v1939_v33 = vld [vmem:[#allocation7 + $0x18] sm:$0xff]   ;;  %v1942_v36 = vld [vmem:[#allocation7] sm:$0xff]   ;;  %v1128_v59 = vld [vmem:[#allocation10 + $0x8] sm:$0xff]  ;;  %p2158_p12 = scmp.lt.s32.totalorder %s2806_s1, %s2156_s18 }
  0x96   : > { %v1127_v47 = vld [vmem:[#allocation10] sm:$0xff]  ;;  %v1633_v60 = vcombine.high %v1128_v59, %v1128_v59  ;;  %v1632_v62 = vcombine.low %v1128_v59, %v1128_v59  ;;  %v2270_v59 = vmov -1.0  }
  0x97   : > { %v1630_v48 = vcombine.low %v1127_v47, %v1127_v47  ;;  %v1631_v49 = vcombine.high %v1127_v47, %v1127_v47  ;;  %v806_v47 = vld [vmem:[#allocation8 + $0x28] sm:$0xff] }
  0x9a   : > { %1657 = vmatpush3.bf16.xpose.msra.mxu0 %v1916_v10 }
  0x9b   : > { %1658 = vmatprep.subr.bf16.mxu0 %v1919_v11 }
  0x9c   : > { %1675 = vmatpush3.bf16.xpose.msra.mxu1 %v2557_v12 }
  0x9d   : > { %1676 = vmatprep.subr.bf16.mxu1 %v2560_v13 }
  0xa2   : > { %1659 = vmatpush3.bf16.xpose.msra.mxu0 %v1920_v14 }
  0xa3   : > { %1660 = vmatprep.subr.bf16.mxu0 %v1923_v15 }
  0xa4   : > { %1677 = vmatpush3.bf16.xpose.msra.mxu1 %v2567_v16 }
  0xa5   : > { %1678 = vmatprep.subr.bf16.mxu1 %v2570_v17 }
  0xaa   : > { %1661 = vmatpush3.bf16.xpose.msra.mxu0 %v1924_v18 }
  0xab   : > { %1662 = vmatprep.subr.bf16.mxu0 %v1927_v20 }
  0xac   : > { %1679 = vmatpush3.bf16.xpose.msra.mxu1 %v2576_v19 }
  0xad   : > { %1680 = vmatprep.subr.bf16.mxu1 %v2580_v21 }
  0xb2   : > { %1663 = vmatpush3.bf16.xpose.msra.mxu0 %v1928_v23 }
  0xb3   : > { %1664 = vmatprep.subr.bf16.mxu0 %v1931_v24 }
  0xb4   : > { %1681 = vmatpush3.bf16.xpose.msra.mxu1 %v2587_v25 }
  0xb5   : > { %1682 = vmatprep.subr.bf16.mxu1 %v2590_v26 }
  0xba   : > { %1665 = vmatpush3.bf16.xpose.msra.mxu0 %v1932_v27 }
  0xbb   : > { %1666 = vmatprep.subr.bf16.mxu0 %v1935_v28 }
  0xbc   : > { %1683 = vmatpush3.bf16.xpose.msra.mxu1 %v2597_v29 }
  0xbd   : > { %1684 = vmatprep.subr.bf16.mxu1 %v2600_v30 }
  0xc2   : > { %1667 = vmatpush3.bf16.xpose.msra.mxu0 %v1936_v31 }
  0xc3   : > { %1749 = vmatprep.subr.bf16.mxu0 %v1939_v33 }
  0xc4   : > { %1685 = vmatpush3.bf16.xpose.msra.mxu1 %v2606_v32 }
  0xc5   : > { %1696 = vmatprep.subr.bf16.mxu1 %v2521_v0 }
  0xc9   : > { %1669 = vmatmul.mubr.bf16.vlgmr.msra.gmra.mxu0 %v498_v22 }
  0xca   : > { %1750 = vmatpush3.bf16.msra.mxu0 %v1939_v33 }
  0xcb   : > { %1687 = vmatmul.mubr.bf16.vlgmr.msra.gmra.mxu1 %v498_v22  ;;  %1751 = vmatprep.subr.bf16.mxu0 %v1940_v34 }
  0xcc   : > { %1697 = vmatpush3.bf16.msra.mxu1 %v2524_v1  ;;  %1175 = vmatprep.mubr.bf16.mxu1 %v1631_v49 }
  0xcd   : > { %1698 = vmatprep.subr.bf16.mxu1 %v2536_v4  ;;  %v803_v4 = vld [vmem:[#allocation8 + $0x10] sm:$0xff] }
  0xce   : > { %1752 = vmatpush3.bf16.msra.mxu0 %v1940_v34 }
  0xcf   : > { %1753 = vmatprep.subr.bf16.mxu0 %v1941_v35 }
  0xd0   : > { %1699 = vmatpush3.bf16.msra.mxu1 %v1912_v6  ;;  %v801_v6 = vld [vmem:[#allocation8] sm:$0xff] }
  0xd1   : > { %1700 = vmatprep.subr.bf16.mxu1 %v1915_v7 }
  0xd2   : > { %1754 = vmatpush3.bf16.msra.mxu0 %v1941_v35 }
  0xd3   : > { %1755 = vmatprep.subr.bf16.mxu0 %v1942_v36 }
  0xd4   : > { %1701 = vmatpush3.bf16.msra.mxu1 %v1916_v10 }
  0xd5   : > { %1702 = vmatprep.subr.bf16.mxu1 %v1919_v11  ;;  %v804_v11 = vld [vmem:[#allocation8 + $0x18] sm:$0xff] }
  0xd6   : > { %1756 = vmatpush3.bf16.msra.mxu0 %v1942_v36 }
  0xd7   : > { %1718 = vmatprep.subr.bf16.mxu0 %v2528_v2 }
  0xd8   : > { %1703 = vmatpush3.bf16.msra.mxu1 %v1920_v14 }
  0xd9   : > { %1704 = vmatprep.subr.bf16.mxu1 %v1923_v15  ;;  %v802_v15 = vld [vmem:[#allocation8 + $0x8] sm:$0xff] }
  0xdc   : > { %1705 = vmatpush3.bf16.msra.mxu1 %v1924_v18 }
  0xdd   : > { %1706 = vmatprep.subr.bf16.mxu1 %v1927_v20 }
  0xe0   : > { %1707 = vmatpush3.bf16.msra.mxu1 %v1928_v23 }
  0xe1   : > { %1708 = vmatprep.subr.bf16.mxu1 %v1931_v24 }
  0xe4   : > { %1709 = vmatpush3.bf16.msra.mxu1 %v1932_v27 }
  0xe5   : > { %1710 = vmatprep.subr.bf16.mxu1 %v1935_v28 }
  0xe8   : > { %1711 = vmatpush3.bf16.msra.mxu1 %v1936_v31  ;;  %v805_v31 = vld [vmem:[#allocation8 + $0x20] sm:$0xff] }
  0xeb   : > { %1176 = vmatmul.mubr.bf16.vlgmr.msra.gmra.mxu1 %v1630_v48 }
 0x189   : > { %v725_v37 = vpop.f32.mrf.mxu0 }
 0x18b   : > { %v727_v38 = vpop.f32.mrf.mxu0  ;;  %v766_v39 = vpop.f32.mrf.mxu1 }
 0x18c   : > { %v1897_v40 = vpack.i.bf16 %v727_v38, %v725_v37 }
 0x18d   : > { %v729_v41 = vpop.f32.mrf.mxu0  ;;  %v768_v42 = vpop.f32.mrf.mxu1 }
 0x18e   : > { %1898 = vrot.lane.b32.xlu0 %v1897_v40, %s2269_s16  ;;  %v1902_v43 = vpack.i.bf16 %v768_v42, %v766_v39 }
 0x18f   : > { %v730_v44 = vpop.f32.mrf.mxu0  ;;  %v770_v45 = vpop.f32.mrf.mxu1 }
 0x191   : > { %v771_v46 = vpop.f32.mrf.mxu1 }
 0x192   : > { %1903 = vrot.lane.b32.xlu0 %v1902_v43, %s2269_s16  ;;  %s2157_s16 = scalar_lea.vmem %s2156_s18, 2048 }
 0x193   : > { %p2159_p3 = scmp.lt.s32.totalorder %s2157_s16, %s2151_s3 }
 0x195   : > { %p2160_p1 = por %p2159_p3, %p2158_p12 }
 0x197   : > { %p2161_p5 = pnand %p2160_p1, %p2154_p9 }
 0x1ab   : > { %v1712_v63 = vpop.f32.mrf.mxu1 }
 0x1ad   : > { %v1713_v0 = vpop.f32.mrf.mxu1 }
 0x1af   : > { %v1715_v1 = vpop.f32.mrf.mxu1 }
 0x1b1   : > { %v1716_v2 = vpop.f32.mrf.mxu1 }
 0x200   : > { %v1899_v50 = vpop.permute.xlu0 %1898 }
 0x201   : > { %v1901_v51 = vunpack.i.h.bf16 %v1899_v50  ;;  %v1900_v52 = vunpack.i.l.bf16 %v1899_v50 }
 0x203   : > { %v790_v53 = vpack.c.bf16 %v1901_v51, %v727_v38  ;;  %v789_v54 = vpack.c.bf16 %v1900_v52, %v725_v37  ;;  %v808_v38 = vld [vmem:[#allocation8 + $0x38] sm:$0xff] }
 0x204   : > { %v1904_v55 = vpop.permute.xlu0 %1903 }
 0x205   : > { %v1905_v56 = vunpack.i.l.bf16 %v1904_v55  ;;  %1757 = vmatprep.mubr.msk.bf16.mxu0 %vm833_vm0, %v789_v54  ;;  %v1906_v58 = vunpack.i.h.bf16 %v1904_v55 }
 0x206   : > { %1758 = vmatmul.mubr.msk.bf16.vlgmr.msra.gmra.mxu0 %vm833_vm0, %v790_v53 }
 0x207   : > { %v791_v57 = vpack.c.bf16 %v1905_v56, %v766_v39  ;;  %1719 = vmatpush3.bf16.msra.mxu0 %v2532_v3  ;;  %v792_v61 = vpack.c.bf16 %v1906_v58, %v768_v42  ;;  %v2632_v3 = vadd.f32 %v1713_v0, %v1712_v63 }
 0x208   : > { %1720 = vmatprep.subr.bf16.mxu0 %v2541_v5 }
 0x209   : > { %1761 = vmatprep.mubr.msk.bf16.mxu0 %vm833_vm0, %v791_v57 }
 0x20b   : > { %1721 = vmatpush3.bf16.msra.mxu0 %v2547_v8 }
 0x20c   : > { %1722 = vmatprep.subr.bf16.mxu0 %v2550_v9 }
 0x20e   : > { %1762 = vmatmul.mubr.msk.bf16.gmra.mxu0 %vm833_vm0, %v792_v61 }
 0x20f   : > { %1723 = vmatpush3.bf16.msra.mxu0 %v2557_v12  ;;  %1215 = vmatprep.mubr.bf16.mxu0 %v1633_v60 }
 0x210   : > { %1724 = vmatprep.subr.bf16.mxu0 %v2560_v13 }
 0x213   : > { %1725 = vmatpush3.bf16.msra.mxu0 %v2567_v16 }
 0x214   : > { %1726 = vmatprep.subr.bf16.mxu0 %v2570_v17 }
 0x217   : > { %1727 = vmatpush3.bf16.msra.mxu0 %v2576_v19 }
 0x218   : > { %1728 = vmatprep.subr.bf16.mxu0 %v2580_v21 }
 0x21b   : > { %1729 = vmatpush3.bf16.msra.mxu0 %v2587_v25 }
 0x21c   : > { %1730 = vmatprep.subr.bf16.mxu0 %v2590_v26 }
 0x21f   : > { %1731 = vmatpush3.bf16.msra.mxu0 %v2597_v29  ;;  %v807_v29 = vld [vmem:[#allocation8 + $0x30] sm:$0xff] }
 0x220   : > { %1732 = vmatprep.subr.bf16.mxu0 %v2600_v30 }
 0x223   : > { %1733 = vmatpush3.bf16.msra.mxu0 %v2606_v32 }
 0x226   : > { %1216 = vmatmul.mubr.bf16.vlgmr.msra.gmra.mxu0 %v1632_v62 }
 0x2c6   : > { %v1759_v5 = vpop.f32.mrf.mxu0 }
 0x2c7   : > { %v889_v7 = vadd.f32 %v1759_v5, %v803_v4 }
 0x2c8   : > { %v880_v8 = vpop.f32.mrf.mxu0 }
 0x2c9   : > { %v921_v9 = vmul.f32 0.70710677, %v889_v7  ;;  %v881_v10 = vadd.f32 %v880_v8, %v801_v6  ;;  %v2659_v48 = vmul.f32 0.5, %v889_v7 }
 0x2ca   : > { %v1760_v12 = vpop.f32.mrf.mxu0 }
 0x2cb   : > { %v945_v13 = vand.u32 2147483647, %v921_v9  ;;  %v919_v14 = vmul.f32 0.70710677, %v881_v10  ;;  %v2634_v16 = vadd.f32 %v1760_v12, %v804_v11  ;;  %vm929_vm1 = vcmp.ge.f32.partialorder %v921_v9, 0.0 }
 0x2cc   : > { %v883_v17 = vpop.f32.mrf.mxu0  ;;  %v2668_v60 = vsel %vm929_vm1, 1.0, %v2270_v59  ;;  %v2670_v61 = vmul.f32 0.5, %v881_v10 }
 0x2cd   : > { %v953_v18 = vmul.f32 0.3275911, %v945_v13  ;;  %v943_v19 = vand.u32 2147483647, %v919_v14  ;;  %v2637_v20 = vmul.f32 0.70710677, %v2634_v16  ;;  %v2639_v21 = vadd.f32 %v883_v17, %v802_v15 }
 0x2ce   : > { %v1763_v22 = vpop.f32.mrf.mxu0  ;;  %v1049_v39 = vsub.f32 0.0, %v945_v13  ;;  %vm927_vm2 = vcmp.ge.f32.partialorder %v919_v14, 0.0  ;;  %v2684_v9 = vmul.f32 0.5, %v2634_v16 }
 0x2cf   : > { %v961_v23 = vadd.f32 1.0, %v953_v18  ;;  %v951_v24 = vmul.f32 0.3275911, %v943_v19  ;;  %v946_v25 = vand.u32 2147483647, %v2637_v20  ;;  %v2646_v34 = vadd.f32 %v1763_v22, %v807_v29 }
 0x2d0   : > { %v2643_v26 = vmul.f32 0.70710677, %v2639_v21  ;;  %v896_v27 = vpop.f32.mrf.mxu0  ;;  %v1047_v43 = vsub.f32 0.0, %v943_v19  ;;  %v1057_v49 = vmul.f32 %v1049_v39, %v945_v13  ;;  %v2679_v2 = vsel %vm927_vm2, 1.0, %v2270_v59 }
 0x2d1   : > { %1955 = vrcp.f32 %v961_v23  ;;  %v959_v28 = vadd.f32 1.0, %v951_v24  ;;  %v954_v30 = vmul.f32 0.3275911, %v946_v25  ;;  %v2648_v37 = vadd.f32 %v896_v27, %v805_v31 }
 0x2d2   : > { %v944_v32 = vand.u32 2147483647, %v2643_v26  ;;  %v1764_v35 = vpop.f32.mrf.mxu0  ;;  %v2651_v40 = vmul.f32 0.70710677, %v2646_v34  ;;  %v1050_v52 = vsub.f32 0.0, %v946_v25  ;;  %v1055_v55 = vmul.f32 %v1047_v43, %v943_v19 }
 0x2d3   : > { %1957 = vrcp.f32 %v959_v28  ;;  %v962_v33 = vadd.f32 1.0, %v954_v30  ;;  %v2654_v42 = vmul.f32 0.70710677, %v2648_v37  ;;  %v2657_v45 = vadd.f32 %v1764_v35, %v808_v38 }
 0x2d4   : > { %v952_v36 = vmul.f32 0.3275911, %v944_v32  ;;  %v949_v44 = vand.u32 2147483647, %v2651_v40  ;;  %v899_v46 = vpop.f32.mrf.mxu0  ;;  %v1048_v56 = vsub.f32 0.0, %v944_v32  ;;  %vm930_vm3 = vcmp.ge.f32.partialorder %v2637_v20, 0.0 }
 0x2d5   : > { %1959 = vrcp.f32 %v962_v33  ;;  %v947_v51 = vand.u32 2147483647, %v2654_v42  ;;  %v2663_v53 = vmul.f32 0.70710677, %v2657_v45  ;;  %v2665_v54 = vadd.f32 %v899_v46, %v806_v47 }
 0x2d6   : > { %v960_v41 = vadd.f32 1.0, %v952_v36  ;;  %v957_v50 = vmul.f32 0.3275911, %v949_v44  ;;  %v1067_v1 = vmul.f32 1.442695, %v1057_v49  ;;  %v1058_v6 = vmul.f32 %v1050_v52, %v946_v25 }
 0x2d7   : > { %v955_v58 = vmul.f32 0.3275911, %v947_v51  ;;  %v950_v62 = vand.u32 2147483647, %v2663_v53  ;;  %v2674_v63 = vmul.f32 0.70710677, %v2665_v54  ;;  %v1056_v10 = vmul.f32 %v1048_v56, %v944_v32 }
 0x2d8   : > { %1961 = vrcp.f32 %v960_v41  ;;  %v965_v57 = vadd.f32 1.0, %v957_v50  ;;  %v1063_v8 = vmul.f32 1.442695, %v1055_v55  ;;  %v1053_v14 = vsub.f32 0.0, %v949_v44 }
 0x2d9   : > { %v963_v4 = vadd.f32 1.0, %v955_v58  ;;  %v958_v7 = vmul.f32 0.3275911, %v950_v62  ;;  %v948_v11 = vand.u32 2147483647, %v2674_v63  ;;  %v2691_v18 = vsel %vm930_vm3, 1.0, %v2270_v59 }
 0x2da   : > { %1963 = vrcp.f32 %v965_v57  ;;  %v1069_v22 = vmul.f32 1.442695, %v1058_v6  ;;  %v1051_v23 = vsub.f32 0.0, %v947_v51  ;;  %v1054_v27 = vsub.f32 0.0, %v950_v62 }
 0x2db   : > { %1965 = vrcp.f32 %v963_v4  ;;  %v966_v15 = vadd.f32 1.0, %v958_v7  ;;  %v956_v19 = vmul.f32 0.3275911, %v948_v11  ;;  %v1065_v30 = vmul.f32 1.442695, %v1056_v10 }
 0x2dc   : > { %1967 = vpow2.f32 %v1067_v1  ;;  %v1061_v31 = vmul.f32 %v1053_v14, %v949_v44  ;;  %v1052_v36 = vsub.f32 0.0, %v948_v11  ;;  %vm928_vm4 = vcmp.ge.f32.partialorder %v2643_v26, 0.0 }
 0x2dd   : > { %1969 = vrcp.f32 %v966_v15  ;;  %v964_v28 = vadd.f32 1.0, %v956_v19  ;;  %v1059_v43 = vmul.f32 %v1051_v23, %v947_v51  ;;  %v1062_v44 = vmul.f32 %v1054_v27, %v950_v62 }
 0x2de   : > { %v2676_v0 = vpop.eup %1955  ;;  %1971 = vpow2.f32 %v1063_v8  ;;  %v1075_v55 = vmul.f32 1.442695, %v1061_v31  ;;  %v1060_v1 = vmul.f32 %v1052_v36, %v948_v11  ;;  %v2717_v11 = vsel %vm928_vm4, 1.0, %v2270_v59 }
 0x2df   : > { %v977_v5 = vmul.f32 1.0614054, %v2676_v0  ;;  %1973 = vrcp.f32 %v964_v28  ;;  %v1071_v7 = vmul.f32 1.442695, %v1059_v43  ;;  %v1077_v14 = vmul.f32 1.442695, %v1062_v44 }
 0x2e0   : > { %v2687_v12 = vpop.eup %1957  ;;  %1975 = vpow2.f32 %v1069_v22  ;;  %vm933_vm5 = vcmp.ge.f32.partialorder %v2651_v40, 0.0  ;;  %vm931_vm6 = vcmp.ge.f32.partialorder %v2654_v42, 0.0  ;;  %vm934_vm7 = vcmp.ge.f32.partialorder %v2663_v53, 0.0 }
 0x2e1   : > { %v985_v13 = vadd.f32 -1.4531521, %v977_v5  ;;  %v975_v17 = vmul.f32 1.0614054, %v2687_v12  ;;  %1977 = vpow2.f32 %v1065_v30  ;;  %v917_v40 = vmul.f32 0.5, %v2646_v34 }
 0x2e2   : > { %v2693_v20 = vpop.eup %1959  ;;  %1979 = vpow2.f32 %v1075_v55  ;;  %vm932_vm8 = vcmp.ge.f32.partialorder %v2674_v63, 0.0  ;;  %v916_v63 = vmul.f32 0.5, %v2665_v54  ;;  %v1951_v54 = vld [vmem:[#allocation11 + $0x18] sm:$0xff]  }
 0x2e3   : > { %v993_v16 = vmul.f32 %v2676_v0, %v985_v13  ;;  %v983_v24 = vadd.f32 -1.4531521, %v975_v17  ;;  %v978_v25 = vmul.f32 1.0614054, %v2693_v20  ;;  %1981 = vpow2.f32 %v1071_v7 }
 0x2e4   : > { %1983 = vpow2.f32 %v1077_v14 }
 0x2e5   : > { %v1001_v29 = vadd.f32 1.4214138, %v993_v16  ;;  %v2697_v32 = vpop.eup %1961  ;;  %v991_v33 = vmul.f32 %v2687_v12, %v983_v24  ;;  %v986_v35 = vadd.f32 -1.4531521, %v978_v25  ;;  %v1073_v24 = vmul.f32 1.442695, %v1060_v1 }
 0x2e6   : > { %v1734_v38 = vpop.f32.mrf.mxu0  ;;  %v976_v41 = vmul.f32 1.0614054, %v2697_v32 }
 0x2e7   : > { %v1009_v39 = vmul.f32 %v2676_v0, %v1001_v29  ;;  %v999_v46 = vadd.f32 1.4214138, %v991_v33  ;;  %v994_v47 = vmul.f32 %v2693_v20, %v986_v35  ;;  %v2705_v5 = vpop.eup %1963  ;;  %1985 = vpow2.f32 %v1073_v24 }
 0x2e8   : > { %v1735_v49 = vpop.f32.mrf.mxu0  ;;  %v984_v52 = vadd.f32 -1.4531521, %v976_v41  ;;  %v981_v13 = vmul.f32 1.0614054, %v2705_v5  ;;  %v2720_v16 = vpop.eup %1965 }
 0x2e9   : > { %v1017_v50 = vadd.f32 -0.28449672, %v1009_v39  ;;  %v1736_v56 = vadd.f32 %v1735_v49, %v1734_v38  ;;  %v1007_v57 = vmul.f32 %v2687_v12, %v999_v46  ;;  %v1002_v58 = vadd.f32 1.4214138, %v994_v47  ;;  %v1968_v25 = vpop.eup %1967 }
 0x2ea   : > { %v1737_v4 = vpop.f32.mrf.mxu0  ;;  %v992_v6 = vmul.f32 %v2697_v32, %v984_v52  ;;  %v989_v23 = vadd.f32 -1.4531521, %v981_v13  ;;  %v979_v26 = vmul.f32 1.0614054, %v2720_v16  ;;  %v2726_v29 = vpop.eup %1969 }
 0x2eb   : > { %v1025_v51 = vmul.f32 %v2676_v0, %v1017_v50  ;;  %v2710_v62 = vadd.f32 %v1736_v56, %v2632_v3  ;;  %v1015_v8 = vadd.f32 -0.28449672, %v1007_v57  ;;  %v1010_v10 = vmul.f32 %v2693_v20, %v1002_v58 }
 0x2ec   : > { %v1738_v15 = vpop.f32.mrf.mxu0  ;;  %v1000_v19 = vadd.f32 1.4214138, %v992_v6  ;;  %v997_v33 = vmul.f32 %v2705_v5, %v989_v23  ;;  %v987_v38 = vadd.f32 -1.4531521, %v979_v26  ;;  %v982_v39 = vmul.f32 1.0614054, %v2726_v29 }
 0x2ed   : > { %v1033_v17 = vadd.f32 0.2548296, %v1025_v51  ;;  %1223 = vadd.xlane.f32.xlu1 %v2710_v62  ;;  %v1023_v3 = vmul.f32 %v2687_v12, %v1015_v8  ;;  %v1018_v22 = vadd.f32 -0.28449672, %v1010_v10 }
 0x2ee   : > { %v1008_v28 = vmul.f32 %v2697_v32, %v1000_v19  ;;  %v1005_v46 = vadd.f32 1.4214138, %v997_v33  ;;  %v995_v50 = vmul.f32 %v2720_v16, %v987_v38  ;;  %v990_v52 = vadd.f32 -1.4531521, %v982_v39 }
 0x2ef   : > { %v1041_v27 = vmul.f32 %v2676_v0, %v1033_v17  ;;  %v1031_v30 = vadd.f32 0.2548296, %v1023_v3  ;;  %v1026_v31 = vmul.f32 %v2693_v20, %v1018_v22  ;;  %v1972_v0 = vpop.eup %1971 }
 0x2f0   : > { %v1016_v36 = vadd.f32 -0.28449672, %v1008_v28  ;;  %v2732_v47 = vpop.eup %1973  ;;  %v1013_v57 = vmul.f32 %v2705_v5, %v1005_v46  ;;  %v1003_v51 = vadd.f32 1.4214138, %v995_v50  ;;  %v998_v6 = vmul.f32 %v2726_v29, %v990_v52 }
 0x2f1   : > { %v1081_v35 = vmul.f32 %v1968_v25, %v1041_v27  ;;  %v1039_v41 = vmul.f32 %v2687_v12, %v1031_v30  ;;  %v1034_v43 = vadd.f32 0.2548296, %v1026_v31  ;;  %v980_v58 = vmul.f32 1.0614054, %v2732_v47  ;;  %v1976_v1 = vpop.eup %1975 }
 0x2f2   : > { %v1024_v49 = vmul.f32 %v2697_v32, %v1016_v36  ;;  %v1021_v10 = vadd.f32 -0.28449672, %v1013_v57  ;;  %v1978_v14 = vpop.eup %1977  ;;  %v1011_v17 = vmul.f32 %v2720_v16, %v1003_v51  ;;  %v1006_v19 = vadd.f32 1.4214138, %v998_v6 }
 0x2f3   : > { %v1089_v44 = vsub.f32 1.0, %v1081_v35  ;;  %v1079_v55 = vmul.f32 %v1972_v0, %v1039_v41  ;;  %v1042_v56 = vmul.f32 %v2693_v20, %v1034_v43  ;;  %v988_v13 = vadd.f32 -1.4531521, %v980_v58  ;;  %v1980_v26 = vpop.eup %1979 }
 0x2f4   : > { %v1032_v4 = vadd.f32 0.2548296, %v1024_v49  ;;  %v1019_v27 = vadd.f32 -0.28449672, %v1011_v17  ;;  %v1014_v28 = vmul.f32 %v2726_v29, %v1006_v19  ;;  %v1982_v36 = vpop.eup %1981  ;;  %v1947_v49 = vld [vmem:[#allocation11 + $0x38] sm:$0xff]   ;;  %v942_v17 = vsel %vm934_vm7, 1.0, %v2270_v59 }
 0x2f5   : > { %v1097_v12 = vmul.f32 %v1089_v44, %v2668_v60  ;;  %v1087_v7 = vsub.f32 1.0, %v1079_v55  ;;  %v1082_v8 = vmul.f32 %v1976_v1, %v1042_v56  ;;  %v1029_v60 = vmul.f32 %v2705_v5, %v1021_v10  ;;  %v1984_v41 = vpop.eup %1983  ;;  %v1948_v1 = vld [vmem:[#allocation11 + $0x30] sm:$0xff]  }
 0x2f6   : > { %v1040_v20 = vmul.f32 %v2697_v32, %v1032_v4  ;;  %v996_v23 = vmul.f32 %v2732_v47, %v988_v13  ;;  %v1022_v35 = vadd.f32 -0.28449672, %v1014_v28  ;;  %v2271_v56 = vmov 0.0  }
 0x2f7   : > { %v1105_v15 = vadd.f32 1.0, %v1097_v12  ;;  %v1095_v3 = vmul.f32 %v1087_v7, %v2679_v2  ;;  %v1090_v22 = vsub.f32 1.0, %v1082_v8  ;;  %v1037_v31 = vadd.f32 0.2548296, %v1029_v60  ;;  %1765 = vmatprep.subr.bf16.mxu1 %v2271_v56  ;;  %1781 = vmatprep.mubr.msk.bf16.mxu1 %vm2272_vm9, %v2271_v56 }
 0x2f8   : > { %v1080_v25 = vmul.f32 %v1978_v14, %v1040_v20  ;;  %v1004_v33 = vadd.f32 1.4214138, %v996_v23  ;;  %v1030_v44 = vmul.f32 %v2726_v29, %v1022_v35  ;;  %1766 = vmatpush3.bf16.msra.mxu1 %v1947_v49  ;;  %v939_v14 = vsel %vm931_vm6, 1.0, %v2270_v59 }
 0x2f9   : > { %v1113_v24 = vmul.f32 %v1105_v15, %v2659_v48  ;;  %v1103_v30 = vadd.f32 1.0, %v1095_v3  ;;  %v1098_v32 = vmul.f32 %v1090_v22, %v2691_v18  ;;  %v1027_v48 = vmul.f32 %v2720_v16, %v1019_v27  ;;  %1767 = vmatprep.subr.bf16.mxu1 %v2271_v56 }
 0x2fa   : > { %v1088_v2 = vsub.f32 1.0, %v1080_v25  ;;  %v1045_v0 = vmul.f32 %v2705_v5, %v1037_v31  ;;  %v1012_v18 = vmul.f32 %v2732_v47, %v1004_v33  ;;  %v912_v5 = vmul.f32 0.5, %v2639_v21  ;;  %v1949_v33 = vld [vmem:[#allocation11 + $0x28] sm:$0xff]  }
 0x2fb   : > { %1121 = vst [vmem:[%s2750_s20 + $0x10] sm:$0xff] %v1113_v24  ;;  %v1111_v38 = vmul.f32 %v1103_v30, %v2670_v61  ;;  %v1106_v39 = vadd.f32 1.0, %v1098_v32  ;;  %v1035_v46 = vadd.f32 0.2548296, %v1027_v48  ;;  %v1986_v61 = vpop.eup %1985  ;;  %v1038_v58 = vadd.f32 0.2548296, %v1030_v44 }
 0x2fc   : > { %v1096_v43 = vmul.f32 %v1088_v2, %v2717_v11  ;;  %v1085_v52 = vmul.f32 %v1980_v26, %v1045_v0  ;;  %v1020_v55 = vadd.f32 -0.28449672, %v1012_v18  ;;  %1768 = vmatpush3.bf16.msra.mxu1 %v1948_v1  ;;  %v915_v19 = vmul.f32 0.5, %v2648_v37  ;;  %v1952_v2 = vld [vmem:[#allocation11 + $0x10] sm:$0xff]   ;;  %v1954_v48 = vld [vmem:[#allocation11] sm:$0xff]  }
 0x2fd   : > { %1119 = vst [vmem:[%s2750_s20] sm:$0xff] %v1111_v38  ;;  %v1114_v50 = vmul.f32 %v1106_v39, %v2684_v9  ;;  %v1043_v11 = vmul.f32 %v2720_v16, %v1035_v46  ;;  %v941_v9 = vsel %vm933_vm5, 1.0, %v2270_v59  ;;  %v1046_v6 = vmul.f32 %v2726_v29, %v1038_v58  ;;  %1769 = vmatprep.subr.bf16.mxu1 %v2271_v56 }
 0x2fe   : > { %v1104_v57 = vadd.f32 1.0, %v1096_v43  ;;  %v1093_v12 = vsub.f32 1.0, %v1085_v52  ;;  %v1028_v4 = vmul.f32 %v2732_v47, %v1020_v55  ;;  %v918_v60 = vmul.f32 0.5, %v2657_v45  ;;  %v1950_v45 = vld [vmem:[#allocation11 + $0x20] sm:$0xff]  }
 0x2ff   : > { %1122 = vst [vmem:[%s2750_s20 + $0x18] sm:$0xff] %v1114_v50  ;;  %v1083_v21 = vmul.f32 %v1982_v36, %v1043_v11  ;;  %v1086_v10 = vmul.f32 %v1984_v41, %v1046_v6  ;;  %v940_v24 = vsel %vm932_vm8, 1.0, %v2270_v59  ;;  %v1236_v39 = vlaneseq  ;;  %v1232_v41 = vld [vmem:[%s2876_s5] sm:$0x3] }
 0x300   : > { %v1112_v51 = vmul.f32 %v1104_v57, %v912_v5  ;;  %v1101_v16 = vmul.f32 %v1093_v12, %v941_v9  ;;  %v1036_v7 = vadd.f32 0.2548296, %v1028_v4  ;;  %1770 = vmatpush3.bf16.msra.mxu1 %v1949_v33 }
 0x301   : > { %v1091_v8 = vsub.f32 1.0, %v1083_v21  ;;  %v1094_v29 = vsub.f32 1.0, %v1086_v10  ;;  %1771 = vmatprep.subr.bf16.mxu1 %v2271_v56  ;;  %v1237_v0 = vshrl.u32 %v1236_v39, 7 }
 0x302   : > { %1120 = vst [vmem:[%s2750_s20 + $0x8] sm:$0xff] %v1112_v51  ;;  %v1109_v13 = vadd.f32 1.0, %v1101_v16  ;;  %v1044_v15 = vmul.f32 %v2732_v47, %v1036_v7 }
 0x303   : > { %v1099_v42 = vmul.f32 %v1091_v8, %v939_v14  ;;  %v1102_v3 = vmul.f32 %v1094_v29, %v942_v17  ;;  %v1238_v18 = vsub.s32 0, %v1237_v0  ;;  %v1243_v43 = vsub.s32 1, %v1237_v0 }
 0x304   : > { %v1117_v20 = vmul.f32 %v1109_v13, %v917_v40  ;;  %v1084_v53 = vmul.f32 %v1986_v61, %v1044_v15  ;;  %1772 = vmatpush3.bf16.msra.mxu1 %v1950_v45 }
 0x305   : > { %v1107_v34 = vadd.f32 1.0, %v1099_v42  ;;  %v1110_v23 = vadd.f32 1.0, %v1102_v3  ;;  %1773 = vmatprep.subr.bf16.mxu1 %v2271_v56  ;;  %v1239_v46 = vrot.slane %v1232_v41, %v1238_v18  ;;  %v1244_v50 = vrot.slane %v1232_v41, %v1243_v43 }
 0x306   : > { %1125 = vst [vmem:[%s2750_s20 + $0x30] sm:$0xff] %v1117_v20  ;;  %v1092_v22 = vsub.f32 1.0, %v1084_v53 }
 0x307   : > { %v1115_v47 = vmul.f32 %v1107_v34, %v915_v19  ;;  %v1118_v27 = vmul.f32 %v1110_v23, %v918_v60 }
 0x308   : > { %v1100_v25 = vmul.f32 %v1092_v22, %v940_v24  ;;  %1774 = vmatpush3.bf16.msra.mxu1 %v1951_v54 }
 0x309   : > { %1123 = vst [vmem:[%s2750_s20 + $0x20] sm:$0xff] %v1115_v47  ;;  %1126 = vst [vmem:[%s2750_s20 + $0x38] sm:$0xff] %v1118_v27  ;;  %1775 = vmatprep.subr.bf16.mxu1 %v2271_v56 }
 0x30a   : > { %v1108_v28 = vadd.f32 1.0, %v1100_v25 }
 0x30c   : > { %v1116_v26 = vmul.f32 %v1108_v28, %v916_v63  ;;  %1776 = vmatpush3.bf16.msra.mxu1 %v1952_v2 }
 0x30d   : > { %1777 = vmatprep.subr.bf16.mxu1 %v2271_v56 }
 0x30e   : > { %1124 = vst [vmem:[%s2750_s20 + $0x28] sm:$0xff] %v1116_v26 }
 0x376   : > { %v1224_v37 = vpop.xlane.xlu1 %1223 }
 0x377   : > { %v1226_v30 = vmul.f32 0.0078125, %v1224_v37 }
 0x379   : > { %v1227_v32 = vsub.f32 %v2710_v62, %v1226_v30  ;;  %v1953_v62 = vld [vmem:[#allocation11 + $0x8] sm:$0xff]  }
 0x37a   : > { %1778 = vmatpush3.bf16.msra.mxu1 %v1953_v62 }
 0x37b   : > { %v1228_v31 = vmul.f32 %v1227_v32, %v1227_v32  ;;  %1779 = vmatprep.subr.bf16.mxu1 %v2271_v56 }
 0x37d   : > { %1229 = vadd.xlane.f32.xlu1 %v1228_v31 }
 0x37e   : > { %1780 = vmatpush3.bf16.msra.mxu1 %v1954_v48 }
 0x406   : > { %v1230_v35 = vpop.xlane.xlu1 %1229 }
 0x407   : > { %v1231_v36 = vmul.f32 0.0078125, %v1230_v35 }
 0x409   : > { %v1233_v38 = vadd.f32 1e-05, %v1231_v36 }
 0x40b   : > { %1987 = vrsqrt.f32 %v1233_v38 }
 0x418   : > { %v1988_v44 = vpop.eup %1987 }
 0x419   : > { %v1235_v49 = vmul.f32 %v1988_v44, %v1227_v32 }
 0x41b   : > { %v1240_v52 = vmul.f32 %v1239_v46, %v1235_v49 }
 0x41d   : > { %v1245_v55 = vadd.f32 %v1244_v50, %v1240_v52 }
 0x41f   : > { %v1246_v56 = vpack.c.bf16 %v1245_v55, %v1245_v55 }
 0x421   : > { %1782 = vmatmul.mubr.bf16.vlgmr.msra.gmra.mxu1 %v1246_v56 }
 0x422   : > { %2164 = shalt.err (!%p2161_p5)
}
 0x423   : > { %s2165_s17 = scalar_lea.hbm %s2803_s21, 1024  ;;  %s2169_s23 = scalar_lea.hbm %s2879_s8, 2048 }
 0x424   : > { %p2166_p6 = scmp.ne.s32.totalorder %s2803_s21, %s2165_s17  ;;  %p2170_p4 = scmp.lt.s32.totalorder %s2803_s21, %s2879_s8 }
 0x425   : > { %p2171_p7 = scmp.lt.s32.totalorder %s2169_s23, %s2165_s17 }
 0x426   : > { %p2167_p11 = pnand %p2166_p6, %p2911_p2 }
 0x427   : > { %p2172_p13 = por %p2171_p7, %p2170_p4 }
 0x428   : > { %p2168_p10 = pneg %p2167_p11 }
 0x42a   : > { %p2173_p0 = pnand %p2172_p13, %p2168_p10 }
 0x42c   : > { %2176 = shalt.err (!%p2173_p0)
}
 0x42d   : > { %s2274_s28 = smov 128   ;;  %s2275_s3 = smov 8   ;;  %v1634_v61 = vld [vmem:[%s2878_s7] ss:$0 sm:$0xff] }
 0x42e   : > { %1807 = dma.vmem_to_hbm [thread:$0]  (%p2911_p2), %s2806_s1, 1024, %s2803_s21, %s1386_s14, %s2274_s28, %s2274_s28, %s2275_s3  }
 0x42f   : > { %s1589_s21 = sshll.u32 %s2498_s2, 3  ;;  %s1647_s1 = sshll.u32 %s2348_s15, 7 }
 0x430   : > { %s430_s14 = scalar_lea.vmem [#allocation14], %s1589_s21  ;;  %s1418_s26 = scalar_lea.hbm %s2880_s9, %s1647_s1 }
 0x431   : > { %s1420_s16 = sshll.u32 %s430_s14, 4  ;;  %s1391_s23 = scalar_lea.sflag [#allocation15], %s2498_s2  ;;  %s1421_s16 = int_to_ptr.vmem [resolvable:$true] %s1420_s16 }
 0x432   : > { %s2177_s19 = scalar_lea.vmem %s1421_s16, 128  ;;  %s2276_s24 = smov [#allocation14]  }
 0x433   : > { %p2178_p8 = scmp.ne.s32.totalorder %s1421_s16, %s2177_s19  ;;  %s2181_s28 = sshll.u32 %s2276_s24, 4  ;;  %s2182_s28 = int_to_ptr.vmem [resolvable:$false] %s2181_s28 }
 0x434   : > { %s2183_s15 = scalar_lea.vmem %s2182_s28, 256  ;;  %p2184_p3 = scmp.lt.s32.totalorder %s1421_s16, %s2182_s28 }
 0x435   : > { %p2179_p9 = pnand %p2178_p8, %p2911_p2  ;;  %p2185_p1 = scmp.lt.s32.totalorder %s2183_s15, %s2177_s19 }
 0x437   : > { %p2180_p12 = pneg %p2179_p9  ;;  %p2186_p5 = por %p2185_p1, %p2184_p3 }
 0x439   : > { %p2187_p6 = pnand %p2186_p5, %p2180_p12 }
 0x4e1   : > { %v1352_v5 = vpop.f32.mrf.mxu1 }
 0x4e2   : > { %v1353_v57 = vadd.f32 %v1634_v61, %v1352_v5 }
 0x4e3   : > { %v1783_v11 = vpop.f32.mrf.mxu1 }
 0x4e4   : > { %v1359_v58 = vmul.f32 0.70710677, %v1353_v57  ;;  %v1358_v22 = vmul.f32 0.5, %v1353_v57 }
 0x4e5   : > { %v1355_v1 = vpop.f32.mrf.mxu1 }
 0x4e6   : > { %v1362_v9 = vand.u32 2147483647, %v1359_v58  ;;  %vm1360_vm10 = vcmp.ge.f32.partialorder %v1359_v58, 0.0 }
 0x4e7   : > { %v1784_v12 = vpop.f32.mrf.mxu1  ;;  %v1361_v34 = vsel %vm1360_vm10, 1.0, %v2270_v59 }
 0x4e8   : > { %v1363_v4 = vmul.f32 0.3275911, %v1362_v9  ;;  %v1375_v21 = vsub.f32 0.0, %v1362_v9 }
 0x4ea   : > { %v1364_v51 = vadd.f32 1.0, %v1363_v4  ;;  %v1376_v6 = vmul.f32 %v1375_v21, %v1362_v9 }
 0x4ec   : > { %1989 = vrcp.f32 %v1364_v51  ;;  %v1377_v8 = vmul.f32 1.442695, %v1376_v6 }
 0x4ee   : > { %1991 = vpow2.f32 %v1377_v8 }
 0x4f9   : > { %v1990_v16 = vpop.eup %1989 }
 0x4fa   : > { %v1366_v7 = vmul.f32 1.0614054, %v1990_v16 }
 0x4fb   : > { %v1992_v17 = vpop.eup %1991 }
 0x4fc   : > { %v1367_v10 = vadd.f32 -1.4531521, %v1366_v7 }
 0x4fe   : > { %v1368_v40 = vmul.f32 %v1990_v16, %v1367_v10 }
 0x500   : > { %v1369_v13 = vadd.f32 1.4214138, %v1368_v40 }
 0x502   : > { %v1370_v14 = vmul.f32 %v1990_v16, %v1369_v13 }
 0x504   : > { %v1371_v15 = vadd.f32 -0.28449672, %v1370_v14 }
 0x506   : > { %v1372_v42 = vmul.f32 %v1990_v16, %v1371_v15 }
 0x508   : > { %v1373_v29 = vadd.f32 0.2548296, %v1372_v42 }
 0x50a   : > { %v1374_v20 = vmul.f32 %v1990_v16, %v1373_v29 }
 0x50c   : > { %v1379_v53 = vmul.f32 %v1992_v17, %v1374_v20 }
 0x50e   : > { %v1380_v19 = vsub.f32 1.0, %v1379_v53 }
 0x510   : > { %v1381_v3 = vmul.f32 %v1380_v19, %v1361_v34 }
 0x512   : > { %v1382_v47 = vadd.f32 1.0, %v1381_v3 }
 0x514   : > { %v1383_v60 = vmul.f32 %v1382_v47, %v1358_v22 }
 0x516   : > { %1384 = vst [vmem:[%s430_s14] sm:$0xff] %v1383_v60 }
 0x517   : > { %2190 = shalt.err (!%p2187_p6)
}
 0x518   : > { %s2191_s3 = scalar_lea.hbm %s1418_s26, 128  ;;  %s2195_s18 = scalar_lea.hbm %s2880_s9, 256 }
 0x519   : > { %p2192_p11 = scmp.ne.s32.totalorder %s1418_s26, %s2191_s3  ;;  %p2196_p7 = scmp.lt.s32.totalorder %s1418_s26, %s2880_s9 }
 0x51a   : > { %p2197_p13 = scmp.lt.s32.totalorder %s2195_s18, %s2191_s3 }
 0x51b   : > { %p2193_p10 = pnand %p2192_p11, %p2911_p2 }
 0x51c   : > { %p2198_p0 = por %p2197_p13, %p2196_p7 }
 0x51d   : > { %p2194_p4 = pneg %p2193_p10 }
 0x51f   : > { %p2199_p8 = pnand %p2198_p0, %p2194_p4 }
 0x521   : > { %2202 = shalt.err (!%p2199_p8)
}
 0x522   : > { %1808 = dma.vmem_to_hbm [thread:$0]  (%p2911_p2), %s1421_s16, 128, %s1418_s26, %s1391_s23  }
 0x523 PF: > { %s1432_s14 = sand.u32 1, %s2245_s30   ;;  %p2912_p9 = scmp.ne.s32.totalorder %s2899_s29, 0 }
 0x524   : > { %p2913_p12 = scmp.ge.s32.totalorder %s2257_s12, 2  ;;  %s1433_s17 = scalar_lea.sflag [#allocation4], %s1432_s14 }
 0x526   : > { %p1832_p3 = pnand %p2913_p12, %p2912_p9 }
 0x528   : > { %p1833_p1 = pneg %p1832_p3 }
 0x52a   : > { %2236 = dma.done.wait (%p1833_p1), %s1433_s17, 1024  }
 0x52b   : > { %2238 = vsyncadd (%p1833_p1), %s1433_s17, 4294966272  ;;  %s1442_s20 = scalar_lea.sflag [#allocation15], %s1432_s14 }
 0x52c   : > { %2240 = dma.done.wait (%p1833_p1), %s1442_s20, 128  }
 0x52d   : > { %2242 = vsyncadd (%p1833_p1), %s1442_s20, 4294967168  ;;  %p29_p2 = scmp.ge.s32.totalorder %s2429_s22, 4   ;;  %s2914_s30 = smov %s2249_s10 }
 0x52e   : > { %s2915_s10 = smov %s2253_s11  ;;  %s2916_s11 = smov %s2441_s25 }
 0x52f   : > { %s2917_s12 = smov %s2429_s22  ;;  %31 = sbr.rel (!%p29_p2) target bundleno = 14 (0xe), region = 134 }
 0x534   :  { %1447 = vsyncpa [#allocation3], 1 }
 0x535   :  { %1449 = vsyncpa [#allocation3 + $0x1], 1 }
 0x536   :  { %1450 = vsyncpa [#allocation6], 1 }
 0x537   :  { %1451 = vsyncpa [#allocation9], 1 }
 0x538   :  { %1452 = vsyncpa [#allocation12], 1 }
 0x539   :  { %1453 = vsyncpa [#allocation4], 1 }
 0x53a   :  { %1455 = vsyncpa [#allocation4 + $0x1], 1 }
 0x53b   :  { %1456 = vsyncpa [#allocation15], 1 }
 0x53c   :  { %1458 = vsyncpa [#allocation15 + $0x1], 1 }

</bundles_post_ra>
